<compile_context>
chip_gen: v6e
topology: v6e:2x2x1
jax: 0.10.0
libtpu: 0.0.40
codegen_flags: <defaults>
</compile_context>

<pallas_src>
import functools

import jax
import jax.numpy as jnp
from jax.experimental import pallas as pl
from jax.experimental.pallas import tpu as pltpu

# ----------------------------- model config --------------------------------
INPUT_DIM   = (16, 16)                 # (H, W) of the vitmap
INCHANNELS  = 1
OUTPUT_DIM  = 2
STRIDE      = 1
CONV_LAYERS = [(8, 5, 2, 1), (4, 3, 2, 1)]   # (num_filt, ksize, maxpool, dilation)
FC_LAYERS   = [32, 16, 16]             # last Linear is removed in VitmapStatCNN
LEAKY_SLOPE = 0.01                     # nn.LeakyReLU default
MAX_BT      = 128                      # batch tile cap (multiple of 8)


def _leaky(x):
    return jnp.maximum(x, LEAKY_SLOPE * x)


# ------------------------------ fused kernel --------------------------------
def vitmap_kernel(xs_ref, stat_ref, t1_ref, b1_ref, t2_ref, b2_ref,
                  wfc1_ref, bfc1_ref, wfc2_ref, bfc2_ref,
                  ws_ref, bs_ref, wfv_ref, wfs_ref, bf_ref, out_ref, *, bt):
    """Whole VitmapStatCNN forward for one batch tile of `bt` samples.

    xs_ref  : (20*bt, 16)  row-padded input, rows ordered (padded_row, batch)
    stat_ref: (bt, 1)
    t1_ref  : (5, 16, 128) banded conv1 weights, out lanes = (dj, col q, chan c)
    t2_ref  : (3, 64, 32)  banded conv2 weights, out lanes = (dj, col q2, chan c2)
    wfc1_ref: (4, 16, 32)  FC1 weights, one (16, 32) block per pooled row r2
    """
    f32 = jnp.float32

    # ---- conv1 (1->8, k=5, pad=2): 5 banded matmuls over the row taps ------
    # z1 rows = (conv_row i 0..15, b); lanes = (dj, q, c).  Each tap's LHS is
    # a single contiguous slice of the row-major padded input.
    z1 = jnp.dot(xs_ref[0:16 * bt, :], t1_ref[0], preferred_element_type=f32)
    for ki in range(1, 5):
        z1 = z1 + jnp.dot(xs_ref[ki * bt:(ki + 16) * bt, :], t1_ref[ki],
                          preferred_element_type=f32)

    # ---- MaxPool2d(2) then bias + LeakyReLU (monotonic => commutes) --------
    # Pooled/activated layer-1 output is built directly with conv2's zero pad
    # rows in place, so conv2's taps are contiguous slices too.
    zrow = jnp.zeros((bt, 64), f32)
    parts = [zrow]                                    # conv2 top pad row (zeros)
    for r in range(8):
        a = jnp.maximum(z1[(2 * r) * bt:(2 * r + 1) * bt],
                        z1[(2 * r + 1) * bt:(2 * r + 2) * bt])    # row pool
        a = jnp.maximum(a[:, :64], a[:, 64:])                     # col pool (dj)
        parts.append(_leaky(a + b1_ref[...]))
    parts.append(zrow)                                # conv2 bottom pad row
    y1p = jnp.concatenate(parts, axis=0)              # (10*bt, 64), lanes (q, c)

    # ---- conv2 (8->4, k=3, pad=1): 3 banded matmuls -------------------------
    z2 = jnp.dot(y1p[0:8 * bt], t2_ref[0], preferred_element_type=f32)
    for kp in range(1, 3):
        z2 = z2 + jnp.dot(y1p[kp * bt:(kp + 8) * bt], t2_ref[kp],
                          preferred_element_type=f32)
    # z2: (8*bt, 32), rows (conv_row i2, b), lanes (dj2, q2, c2)

    # ---- pool + bias + LeakyReLU fused into FC1 (64 -> 32) ------------------
    h = None
    for r2 in range(4):
        a = jnp.maximum(z2[(2 * r2) * bt:(2 * r2 + 1) * bt],
                        z2[(2 * r2 + 1) * bt:(2 * r2 + 2) * bt])  # row pool
        a = jnp.maximum(a[:, :16], a[:, 16:])                     # col pool
        y2r = _leaky(a + b2_ref[...])                 # (bt, 16), lanes (q2, c2)
        d = jnp.dot(y2r, wfc1_ref[r2], preferred_element_type=f32)
        h = d if h is None else h + d
    h = _leaky(h + bfc1_ref[...])
    # TODO(synk): nn.Dropout(p=0.0) is the identity at inference and is omitted.

    # ---- FC2 (32 -> 16) + LeakyReLU ----------------------------------------
    h = _leaky(jnp.dot(h, wfc2_ref[...], preferred_element_type=f32)
               + bfc2_ref[...])

    # ---- stat net (Linear(1,1)+Sigmoid), concat, final Linear + Sigmoid ----
    stat_out = jax.nn.sigmoid(stat_ref[...] * ws_ref[...] + bs_ref[...])  # (bt,1)
    z = jnp.dot(h, wfv_ref[...], preferred_element_type=f32)
    z = z + stat_out * wfs_ref[...] + bf_ref[...]
    out_ref[...] = jax.nn.sigmoid(z).astype(out_ref.dtype)


# ----------------------- weight repacking (host/XLA side) -------------------
def _prep_weights(params):
    """Repack torch-convention weights into MXU-friendly banded matrices."""
    f32 = jnp.float32
    (w1, b1), (w2, b2) = params["conv"]            # (8,1,5,5),(8,)  (4,8,3,3),(4,)
    w1s = w1[:, 0].astype(f32)                     # (8, 5, 5)

    # T1[ki, xc, dj*64 + q*8 + c] = w1[c, ki, xc + 2 - (2q + dj)]
    # xc is the ORIGINAL input column (conv1's pad=2 is folded into the band).
    ki = jnp.arange(5)[:, None, None]
    xc = jnp.arange(16)[None, :, None]
    lane = jnp.arange(128)[None, None, :]
    dj, rem = lane // 64, lane % 64
    q, c = rem // 8, rem % 8
    kj = xc + 2 - 2 * q - dj
    t1 = jnp.where((kj >= 0) & (kj < 5), w1s[c, ki, jnp.clip(kj, 0, 4)], 0.0)
    b1l = jnp.tile(b1.astype(f32), 8).reshape(1, 64)        # lanes (q, c)

    # T2[kp, q1*8 + c1, dj*16 + q2*4 + c2] = w2[c2, c1, kp, q1 + 1 - (2q2 + dj)]
    kp = jnp.arange(3)[:, None, None]
    lin = jnp.arange(64)[None, :, None]
    q1, c1 = lin // 8, lin % 8
    lout = jnp.arange(32)[None, None, :]
    dj2, rem2 = lout // 16, lout % 16
    q2, c2 = rem2 // 4, rem2 % 4
    kq = q1 - 2 * q2 - dj2 + 1
    t2 = jnp.where((kq >= 0) & (kq < 3),
                   w2.astype(f32)[c2, c1, kp, jnp.clip(kq, 0, 2)], 0.0)
    b2l = jnp.tile(b2.astype(f32), 4).reshape(1, 16)        # lanes (q2, c2)

    (wl1, bl1), (wl2, bl2) = params["lin"]         # (32,64),(32,)  (16,32),(16,)
    # reorder FC1 input dim from NCHW flatten (c2, r2, q2) to kernel layout
    # (row-block r2, lane = q2*4 + c2)
    wfc1 = wl1.astype(f32).reshape(32, 4, 4, 4).transpose(2, 3, 1, 0).reshape(4, 16, 32)
    bfc1 = bl1.astype(f32).reshape(1, 32)
    wfc2 = wl2.astype(f32).T                       # (32, 16)
    bfc2 = bl2.astype(f32).reshape(1, 16)

    ws = params["stat_w"].astype(f32).reshape(1, 1)
    bs = params["stat_b"].astype(f32).reshape(1, 1)
    wf = params["final_w"].astype(f32)             # (2, 17)
    wfv = wf[:, :16].T                             # (16, 2) vitmap part
    wfs = wf[:, 16:17].T                           # (1, 2)  stat part
    bf = params["final_b"].astype(f32).reshape(1, 2)
    return t1, b1l, t2, b2l, wfc1, bfc1, wfc2, bfc2, ws, bs, wfv, wfs, bf


# ------------------------------ forward pass --------------------------------
def vitmap_stat_cnn_forward(params, y_vitmap, y_stat):
    f32 = jnp.float32
    H, W = INPUT_DIM
    x = y_vitmap.reshape(-1, H, W).astype(f32)     # inchannels == 1
    stat = y_stat.reshape(-1, 1).astype(f32)
    B = x.shape[0]

    # batch tiling: one grid step per `bt` samples (bt multiple of 8, <= 128)
    bt = min(MAX_BT, ((B + 7) // 8) * 8)
    bpad = ((B + bt - 1) // bt) * bt
    nt = bpad // bt
    x = jnp.pad(x, ((0, bpad - B), (0, 0), (0, 0)))
    stat = jnp.pad(stat, ((0, bpad - B), (0, 0)))

    # Row-pad only (conv1 pad=2 on rows; column pad lives in the banded
    # weights) and reorder rows to (tile, padded_row, batch, col) so every
    # in-kernel conv row-tap is one contiguous static slice.
    # HBM traffic: 20*16 f32 per sample -- no im2col blow-up.
    xpad = jnp.pad(x, ((0, 0), (2, 2), (0, 0)))                 # (bpad, 20, 16)
    xs = xpad.reshape(nt, bt, H + 4, W).transpose(0, 2, 1, 3)
    xs = xs.reshape(nt * (H + 4) * bt, W)                       # (nt*20*bt, 16)

    weights = _prep_weights(params)

    pin2 = lambda i: (0, 0)
    pin3 = lambda i: (0, 0, 0)
    w_specs = [
        pl.BlockSpec((5, 16, 128), pin3),   # t1
        pl.BlockSpec((1, 64), pin2),        # b1l
        pl.BlockSpec((3, 64, 32), pin3),    # t2
        pl.BlockSpec((1, 16), pin2),        # b2l
        pl.BlockSpec((4, 16, 32), pin3),    # wfc1
        pl.BlockSpec((1, 32), pin2),        # bfc1
        pl.BlockSpec((32, 16), pin2),       # wfc2
        pl.BlockSpec((1, 16), pin2),        # bfc2
        pl.BlockSpec((1, 1), pin2),         # ws
        pl.BlockSpec((1, 1), pin2),         # bs
        pl.BlockSpec((16, 2), pin2),        # wfv
        pl.BlockSpec((1, 2), pin2),         # wfs
        pl.BlockSpec((1, 2), pin2),         # bf
    ]
    out = pl.pallas_call(
        functools.partial(vitmap_kernel, bt=bt),
        out_shape=jax.ShapeDtypeStruct((bpad, OUTPUT_DIM), f32),
        grid=(nt,),
        in_specs=[pl.BlockSpec(((H + 4) * bt, W), lambda i: (i, 0)),
                  pl.BlockSpec((bt, 1), lambda i: (i, 0))] + w_specs,
        out_specs=pl.BlockSpec((bt, OUTPUT_DIM), lambda i: (i, 0)),
        compiler_params=pltpu.CompilerParams(
            dimension_semantics=("parallel",)),
    )(xs, stat, *weights)
    return out[:B]


# ------------------------------ reference -----------------------------------
def reference_forward(params, y_vitmap, y_stat):
    """Pure-JAX (XLA) reference matching the PyTorch module semantics."""
    x = y_vitmap.reshape(-1, INCHANNELS, INPUT_DIM[0], INPUT_DIM[1]).astype(jnp.float32)
    for (w, b), (nf, k, pool, dil) in zip(params["conv"], CONV_LAYERS):
        pad = int(k / 2)
        x = jax.lax.conv_general_dilated(
            x, w, window_strides=(STRIDE, STRIDE),
            padding=[(pad, pad), (pad, pad)], rhs_dilation=(dil, dil),
            dimension_numbers=("NCHW", "OIHW", "NCHW"))
        x = x + b.reshape(1, -1, 1, 1)
        x = jnp.where(x >= 0, x, LEAKY_SLOPE * x)
        x = jax.lax.reduce_window(x, -jnp.inf, jax.lax.max,
                                  (1, 1, pool, pool), (1, 1, pool, pool), "VALID")
    x = x.reshape(x.shape[0], -1)
    for w, b in params["lin"]:
        x = x @ w.T + b
        x = jnp.where(x >= 0, x, LEAKY_SLOPE * x)
    stat = y_stat.reshape(-1, 1).astype(jnp.float32)
    stat_out = jax.nn.sigmoid(stat @ params["stat_w"].T + params["stat_b"])
    cat = jnp.concatenate([x, stat_out], axis=1)
    return jax.nn.sigmoid(cat @ params["final_w"].T + params["final_b"])


# ------------------------------ param init ----------------------------------
def init_params(key):
    params = {"conv": [], "lin": []}
    inch = INCHANNELS
    for (nf, k, pool, dil) in CONV_LAYERS:
        key, k1, k2 = jax.random.split(key, 3)
        params["conv"].append((
            jax.random.normal(k1, (nf, inch, k, k), jnp.float32) * 0.1,
            jax.random.normal(k2, (nf,), jnp.float32) * 0.1,
        ))
        inch = nf

    # conv output size (analytic, matches CNN.conv_out_size)
    h, w = INPUT_DIM
    for (nf, k, pool, dil) in CONV_LAYERS:
        pad = int(k / 2)
        h = int(((h + 2 * pad - dil * (k - 1) - 1) / STRIDE + 1) / pool)
        w = int(((w + 2 * pad - dil * (k - 1) - 1) / STRIDE + 1) / pool)
    lin_in = CONV_LAYERS[-1][0] * h * w

    # only the Linear layers that survive the [:-1] truncation (all but last)
    layer_size = lin_in
    for width in FC_LAYERS[:-1]:
        key, k1, k2 = jax.random.split(key, 3)
        params["lin"].append((
            jax.random.normal(k1, (width, layer_size), jnp.float32) * 0.1,
            jax.random.normal(k2, (width,), jnp.float32) * 0.1,
        ))
        layer_size = width

    key, k1, k2, k3, k4 = jax.random.split(key, 5)
    params["stat_w"] = jax.random.normal(k1, (1, 1), jnp.float32) * 0.5
    params["stat_b"] = jax.random.normal(k2, (1,), jnp.float32) * 0.5
    params["final_w"] = jax.random.normal(k3, (OUTPUT_DIM, FC_LAYERS[-1] + 1),
                                          jnp.float32) * 0.1
    params["final_b"] = jax.random.normal(k4, (OUTPUT_DIM,), jnp.float32) * 0.1
    return params


# --------------------------------- main --------------------------------------
if __name__ == "__main__":
    key = jax.random.PRNGKey(0)
    kparam, kv, ks = jax.random.split(key, 3)

    params = init_params(kparam)
    y_vitmap = jax.random.normal(kv, (2, INPUT_DIM[0], INPUT_DIM[1]), jnp.float32)
    y_stat = jax.random.normal(ks, (2,), jnp.float32)

    fwd = jax.jit(vitmap_stat_cnn_forward)
    out = fwd(params, y_vitmap, y_stat)
    jax.block_until_ready(out)

    ref = reference_forward(params, y_vitmap, y_stat)

    assert out.shape == (2, OUTPUT_DIM)
    assert bool(jnp.all(jnp.isfinite(out)))
    assert bool(jnp.allclose(out, ref, atol=2e-2, rtol=0.0)), \
        f"max diff {float(jnp.max(jnp.abs(out - ref)))}"
    print("KERNEL_OK")
</pallas_src>

<mosaic_0001>
module attributes {stable_mosaic.version = 11 : i64} {
  func.func @vitmap_kernel(%arg0: i32, %arg1: memref<160x16xf32, #tpu.memory_space<vmem>>, %arg2: memref<8x1xf32, #tpu.memory_space<vmem>>, %arg3: memref<5x16x128xf32, #tpu.memory_space<vmem>>, %arg4: memref<1x64xf32, #tpu.memory_space<vmem>>, %arg5: memref<3x64x32xf32, #tpu.memory_space<vmem>>, %arg6: memref<1x16xf32, #tpu.memory_space<vmem>>, %arg7: memref<4x16x32xf32, #tpu.memory_space<vmem>>, %arg8: memref<1x32xf32, #tpu.memory_space<vmem>>, %arg9: memref<32x16xf32, #tpu.memory_space<vmem>>, %arg10: memref<1x16xf32, #tpu.memory_space<vmem>>, %arg11: memref<1x1xf32, #tpu.memory_space<vmem>>, %arg12: memref<1x1xf32, #tpu.memory_space<vmem>>, %arg13: memref<16x2xf32, #tpu.memory_space<vmem>>, %arg14: memref<1x2xf32, #tpu.memory_space<vmem>>, %arg15: memref<1x2xf32, #tpu.memory_space<vmem>>, %arg16: memref<8x2xf32, #tpu.memory_space<vmem>>) attributes {dimension_semantics = [#tpu.dimension_semantics<parallel>], iteration_bounds = array<i64: 1>, scalar_prefetch = 0 : i64, scratch_operands = 0 : i64, tpu.core_type = #tpu.core_type<tc>, window_params = [{transform_indices = @transform_0, window_bounds = array<i64: 160, 16>}, {transform_indices = @transform_1, window_bounds = array<i64: 8, 1>}, {pipeline_mode = #tpu.pipeline_mode<synchronous>, transform_indices = @transform_2, window_bounds = array<i64: 5, 16, 128>}, {pipeline_mode = #tpu.pipeline_mode<synchronous>, transform_indices = @transform_3, window_bounds = array<i64: 1, 64>}, {pipeline_mode = #tpu.pipeline_mode<synchronous>, transform_indices = @transform_4, window_bounds = array<i64: 3, 64, 32>}, {pipeline_mode = #tpu.pipeline_mode<synchronous>, transform_indices = @transform_5, window_bounds = array<i64: 1, 16>}, {pipeline_mode = #tpu.pipeline_mode<synchronous>, transform_indices = @transform_6, window_bounds = array<i64: 4, 16, 32>}, {pipeline_mode = #tpu.pipeline_mode<synchronous>, transform_indices = @transform_7, window_bounds = array<i64: 1, 32>}, {pipeline_mode = #tpu.pipeline_mode<synchronous>, transform_indices = @transform_8, window_bounds = array<i64: 32, 16>}, {pipeline_mode = #tpu.pipeline_mode<synchronous>, transform_indices = @transform_9, window_bounds = array<i64: 1, 16>}, {pipeline_mode = #tpu.pipeline_mode<synchronous>, transform_indices = @transform_10, window_bounds = array<i64: 1, 1>}, {pipeline_mode = #tpu.pipeline_mode<synchronous>, transform_indices = @transform_11, window_bounds = array<i64: 1, 1>}, {pipeline_mode = #tpu.pipeline_mode<synchronous>, transform_indices = @transform_12, window_bounds = array<i64: 16, 2>}, {pipeline_mode = #tpu.pipeline_mode<synchronous>, transform_indices = @transform_13, window_bounds = array<i64: 1, 2>}, {pipeline_mode = #tpu.pipeline_mode<synchronous>, transform_indices = @transform_14, window_bounds = array<i64: 1, 2>}, {transform_indices = @transform_15, window_bounds = array<i64: 8, 2>}]} {
    %c0 = arith.constant 0 : index
    %c0_0 = arith.constant 0 : index
    %0 = vector.load %arg1[%c0, %c0_0] : memref<160x16xf32, #tpu.memory_space<vmem>>, vector<128x16xf32>
    %c0_1 = arith.constant 0 : index
    %c0_2 = arith.constant 0 : index
    %c0_3 = arith.constant 0 : index
    %1 = vector.load %arg3[%c0_1, %c0_2, %c0_3] : memref<5x16x128xf32, #tpu.memory_space<vmem>>, vector<1x16x128xf32>
    %2 = vector.shape_cast %1 : vector<1x16x128xf32> to vector<16x128xf32>
    %cst = arith.constant dense<0.000000e+00> : vector<128x128xf32>
    %3 = tpu.matmul %0, %2, %cst {dimension_numbers = #tpu.dot_dimension_numbers<[1], [0], [0], [1], [0, 0, 1, 1], [], []>} : vector<128x16xf32>, vector<16x128xf32>, vector<128x128xf32> -> vector<128x128xf32>
    %c8 = arith.constant 8 : index
    %c0_4 = arith.constant 0 : index
    %4 = vector.load %arg1[%c8, %c0_4] : memref<160x16xf32, #tpu.memory_space<vmem>>, vector<128x16xf32>
    %c1 = arith.constant 1 : index
    %c0_5 = arith.constant 0 : index
    %c0_6 = arith.constant 0 : index
    %5 = vector.load %arg3[%c1, %c0_5, %c0_6] : memref<5x16x128xf32, #tpu.memory_space<vmem>>, vector<1x16x128xf32>
    %6 = vector.shape_cast %5 : vector<1x16x128xf32> to vector<16x128xf32>
    %cst_7 = arith.constant dense<0.000000e+00> : vector<128x128xf32>
    %7 = tpu.matmul %4, %6, %cst_7 {dimension_numbers = #tpu.dot_dimension_numbers<[1], [0], [0], [1], [0, 0, 1, 1], [], []>} : vector<128x16xf32>, vector<16x128xf32>, vector<128x128xf32> -> vector<128x128xf32>
    %8 = arith.addf %3, %7 : vector<128x128xf32>
    %c16 = arith.constant 16 : index
    %c0_8 = arith.constant 0 : index
    %9 = vector.load %arg1[%c16, %c0_8] : memref<160x16xf32, #tpu.memory_space<vmem>>, vector<128x16xf32>
    %c2 = arith.constant 2 : index
    %c0_9 = arith.constant 0 : index
    %c0_10 = arith.constant 0 : index
    %10 = vector.load %arg3[%c2, %c0_9, %c0_10] : memref<5x16x128xf32, #tpu.memory_space<vmem>>, vector<1x16x128xf32>
    %11 = vector.shape_cast %10 : vector<1x16x128xf32> to vector<16x128xf32>
    %cst_11 = arith.constant dense<0.000000e+00> : vector<128x128xf32>
    %12 = tpu.matmul %9, %11, %cst_11 {dimension_numbers = #tpu.dot_dimension_numbers<[1], [0], [0], [1], [0, 0, 1, 1], [], []>} : vector<128x16xf32>, vector<16x128xf32>, vector<128x128xf32> -> vector<128x128xf32>
    %13 = arith.addf %8, %12 : vector<128x128xf32>
    %c24 = arith.constant 24 : index
    %c0_12 = arith.constant 0 : index
    %14 = vector.load %arg1[%c24, %c0_12] : memref<160x16xf32, #tpu.memory_space<vmem>>, vector<128x16xf32>
    %c3 = arith.constant 3 : index
    %c0_13 = arith.constant 0 : index
    %c0_14 = arith.constant 0 : index
    %15 = vector.load %arg3[%c3, %c0_13, %c0_14] : memref<5x16x128xf32, #tpu.memory_space<vmem>>, vector<1x16x128xf32>
    %16 = vector.shape_cast %15 : vector<1x16x128xf32> to vector<16x128xf32>
    %cst_15 = arith.constant dense<0.000000e+00> : vector<128x128xf32>
    %17 = tpu.matmul %14, %16, %cst_15 {dimension_numbers = #tpu.dot_dimension_numbers<[1], [0], [0], [1], [0, 0, 1, 1], [], []>} : vector<128x16xf32>, vector<16x128xf32>, vector<128x128xf32> -> vector<128x128xf32>
    %18 = arith.addf %13, %17 : vector<128x128xf32>
    %c32 = arith.constant 32 : index
    %c0_16 = arith.constant 0 : index
    %19 = vector.load %arg1[%c32, %c0_16] : memref<160x16xf32, #tpu.memory_space<vmem>>, vector<128x16xf32>
    %c4 = arith.constant 4 : index
    %c0_17 = arith.constant 0 : index
    %c0_18 = arith.constant 0 : index
    %20 = vector.load %arg3[%c4, %c0_17, %c0_18] : memref<5x16x128xf32, #tpu.memory_space<vmem>>, vector<1x16x128xf32>
    %21 = vector.shape_cast %20 : vector<1x16x128xf32> to vector<16x128xf32>
    %cst_19 = arith.constant dense<0.000000e+00> : vector<128x128xf32>
    %22 = tpu.matmul %19, %21, %cst_19 {dimension_numbers = #tpu.dot_dimension_numbers<[1], [0], [0], [1], [0, 0, 1, 1], [], []>} : vector<128x16xf32>, vector<16x128xf32>, vector<128x128xf32> -> vector<128x128xf32>
    %23 = arith.addf %18, %22 : vector<128x128xf32>
    %cst_20 = arith.constant 0.000000e+00 : f32
    %24 = vector.broadcast %cst_20 : f32 to vector<8x64xf32>
    %25 = vector.extract_strided_slice %23 {offsets = [0, 0], sizes = [8, 128], strides = [1, 1]} : vector<128x128xf32> to vector<8x128xf32>
    %26 = vector.extract_strided_slice %23 {offsets = [8, 0], sizes = [8, 128], strides = [1, 1]} : vector<128x128xf32> to vector<8x128xf32>
    %27 = arith.maximumf %25, %26 : vector<8x128xf32>
    %28 = vector.extract_strided_slice %27 {offsets = [0, 0], sizes = [8, 64], strides = [1, 1]} : vector<8x128xf32> to vector<8x64xf32>
    %29 = vector.extract_strided_slice %27 {offsets = [0, 64], sizes = [8, 64], strides = [1, 1]} : vector<8x128xf32> to vector<8x64xf32>
    %30 = arith.maximumf %28, %29 : vector<8x64xf32>
    %c0_21 = arith.constant 0 : index
    %c0_22 = arith.constant 0 : index
    %31 = vector.load %arg4[%c0_21, %c0_22] : memref<1x64xf32, #tpu.memory_space<vmem>>, vector<1x64xf32>
    %32 = vector.broadcast %31 : vector<1x64xf32> to vector<8x64xf32>
    %33 = arith.addf %30, %32 : vector<8x64xf32>
    %cst_23 = arith.constant 0.00999999977 : f32
    %34 = vector.broadcast %cst_23 : f32 to vector<8x64xf32>
    %35 = arith.mulf %34, %33 : vector<8x64xf32>
    %36 = arith.maximumf %33, %35 : vector<8x64xf32>
    %37 = vector.extract_strided_slice %23 {offsets = [16, 0], sizes = [8, 128], strides = [1, 1]} : vector<128x128xf32> to vector<8x128xf32>
    %38 = vector.extract_strided_slice %23 {offsets = [24, 0], sizes = [8, 128], strides = [1, 1]} : vector<128x128xf32> to vector<8x128xf32>
    %39 = arith.maximumf %37, %38 : vector<8x128xf32>
    %40 = vector.extract_strided_slice %39 {offsets = [0, 0], sizes = [8, 64], strides = [1, 1]} : vector<8x128xf32> to vector<8x64xf32>
    %41 = vector.extract_strided_slice %39 {offsets = [0, 64], sizes = [8, 64], strides = [1, 1]} : vector<8x128xf32> to vector<8x64xf32>
    %42 = arith.maximumf %40, %41 : vector<8x64xf32>
    %c0_24 = arith.constant 0 : index
    %c0_25 = arith.constant 0 : index
    %43 = vector.load %arg4[%c0_24, %c0_25] : memref<1x64xf32, #tpu.memory_space<vmem>>, vector<1x64xf32>
    %44 = vector.broadcast %43 : vector<1x64xf32> to vector<8x64xf32>
    %45 = arith.addf %42, %44 : vector<8x64xf32>
    %cst_26 = arith.constant 0.00999999977 : f32
    %46 = vector.broadcast %cst_26 : f32 to vector<8x64xf32>
    %47 = arith.mulf %46, %45 : vector<8x64xf32>
    %48 = arith.maximumf %45, %47 : vector<8x64xf32>
    %49 = vector.extract_strided_slice %23 {offsets = [32, 0], sizes = [8, 128], strides = [1, 1]} : vector<128x128xf32> to vector<8x128xf32>
    %50 = vector.extract_strided_slice %23 {offsets = [40, 0], sizes = [8, 128], strides = [1, 1]} : vector<128x128xf32> to vector<8x128xf32>
    %51 = arith.maximumf %49, %50 : vector<8x128xf32>
    %52 = vector.extract_strided_slice %51 {offsets = [0, 0], sizes = [8, 64], strides = [1, 1]} : vector<8x128xf32> to vector<8x64xf32>
    %53 = vector.extract_strided_slice %51 {offsets = [0, 64], sizes = [8, 64], strides = [1, 1]} : vector<8x128xf32> to vector<8x64xf32>
    %54 = arith.maximumf %52, %53 : vector<8x64xf32>
    %c0_27 = arith.constant 0 : index
    %c0_28 = arith.constant 0 : index
    %55 = vector.load %arg4[%c0_27, %c0_28] : memref<1x64xf32, #tpu.memory_space<vmem>>, vector<1x64xf32>
    %56 = vector.broadcast %55 : vector<1x64xf32> to vector<8x64xf32>
    %57 = arith.addf %54, %56 : vector<8x64xf32>
    %cst_29 = arith.constant 0.00999999977 : f32
    %58 = vector.broadcast %cst_29 : f32 to vector<8x64xf32>
    %59 = arith.mulf %58, %57 : vector<8x64xf32>
    %60 = arith.maximumf %57, %59 : vector<8x64xf32>
    %61 = vector.extract_strided_slice %23 {offsets = [48, 0], sizes = [8, 128], strides = [1, 1]} : vector<128x128xf32> to vector<8x128xf32>
    %62 = vector.extract_strided_slice %23 {offsets = [56, 0], sizes = [8, 128], strides = [1, 1]} : vector<128x128xf32> to vector<8x128xf32>
    %63 = arith.maximumf %61, %62 : vector<8x128xf32>
    %64 = vector.extract_strided_slice %63 {offsets = [0, 0], sizes = [8, 64], strides = [1, 1]} : vector<8x128xf32> to vector<8x64xf32>
    %65 = vector.extract_strided_slice %63 {offsets = [0, 64], sizes = [8, 64], strides = [1, 1]} : vector<8x128xf32> to vector<8x64xf32>
    %66 = arith.maximumf %64, %65 : vector<8x64xf32>
    %c0_30 = arith.constant 0 : index
    %c0_31 = arith.constant 0 : index
    %67 = vector.load %arg4[%c0_30, %c0_31] : memref<1x64xf32, #tpu.memory_space<vmem>>, vector<1x64xf32>
    %68 = vector.broadcast %67 : vector<1x64xf32> to vector<8x64xf32>
    %69 = arith.addf %66, %68 : vector<8x64xf32>
    %cst_32 = arith.constant 0.00999999977 : f32
    %70 = vector.broadcast %cst_32 : f32 to vector<8x64xf32>
    %71 = arith.mulf %70, %69 : vector<8x64xf32>
    %72 = arith.maximumf %69, %71 : vector<8x64xf32>
    %73 = vector.extract_strided_slice %23 {offsets = [64, 0], sizes = [8, 128], strides = [1, 1]} : vector<128x128xf32> to vector<8x128xf32>
    %74 = vector.extract_strided_slice %23 {offsets = [72, 0], sizes = [8, 128], strides = [1, 1]} : vector<128x128xf32> to vector<8x128xf32>
    %75 = arith.maximumf %73, %74 : vector<8x128xf32>
    %76 = vector.extract_strided_slice %75 {offsets = [0, 0], sizes = [8, 64], strides = [1, 1]} : vector<8x128xf32> to vector<8x64xf32>
    %77 = vector.extract_strided_slice %75 {offsets = [0, 64], sizes = [8, 64], strides = [1, 1]} : vector<8x128xf32> to vector<8x64xf32>
    %78 = arith.maximumf %76, %77 : vector<8x64xf32>
    %c0_33 = arith.constant 0 : index
    %c0_34 = arith.constant 0 : index
    %79 = vector.load %arg4[%c0_33, %c0_34] : memref<1x64xf32, #tpu.memory_space<vmem>>, vector<1x64xf32>
    %80 = vector.broadcast %79 : vector<1x64xf32> to vector<8x64xf32>
    %81 = arith.addf %78, %80 : vector<8x64xf32>
    %cst_35 = arith.constant 0.00999999977 : f32
    %82 = vector.broadcast %cst_35 : f32 to vector<8x64xf32>
    %83 = arith.mulf %82, %81 : vector<8x64xf32>
    %84 = arith.maximumf %81, %83 : vector<8x64xf32>
    %85 = vector.extract_strided_slice %23 {offsets = [80, 0], sizes = [8, 128], strides = [1, 1]} : vector<128x128xf32> to vector<8x128xf32>
    %86 = vector.extract_strided_slice %23 {offsets = [88, 0], sizes = [8, 128], strides = [1, 1]} : vector<128x128xf32> to vector<8x128xf32>
    %87 = arith.maximumf %85, %86 : vector<8x128xf32>
    %88 = vector.extract_strided_slice %87 {offsets = [0, 0], sizes = [8, 64], strides = [1, 1]} : vector<8x128xf32> to vector<8x64xf32>
    %89 = vector.extract_strided_slice %87 {offsets = [0, 64], sizes = [8, 64], strides = [1, 1]} : vector<8x128xf32> to vector<8x64xf32>
    %90 = arith.maximumf %88, %89 : vector<8x64xf32>
    %c0_36 = arith.constant 0 : index
    %c0_37 = arith.constant 0 : index
    %91 = vector.load %arg4[%c0_36, %c0_37] : memref<1x64xf32, #tpu.memory_space<vmem>>, vector<1x64xf32>
    %92 = vector.broadcast %91 : vector<1x64xf32> to vector<8x64xf32>
    %93 = arith.addf %90, %92 : vector<8x64xf32>
    %cst_38 = arith.constant 0.00999999977 : f32
    %94 = vector.broadcast %cst_38 : f32 to vector<8x64xf32>
    %95 = arith.mulf %94, %93 : vector<8x64xf32>
    %96 = arith.maximumf %93, %95 : vector<8x64xf32>
    %97 = vector.extract_strided_slice %23 {offsets = [96, 0], sizes = [8, 128], strides = [1, 1]} : vector<128x128xf32> to vector<8x128xf32>
    %98 = vector.extract_strided_slice %23 {offsets = [104, 0], sizes = [8, 128], strides = [1, 1]} : vector<128x128xf32> to vector<8x128xf32>
    %99 = arith.maximumf %97, %98 : vector<8x128xf32>
    %100 = vector.extract_strided_slice %99 {offsets = [0, 0], sizes = [8, 64], strides = [1, 1]} : vector<8x128xf32> to vector<8x64xf32>
    %101 = vector.extract_strided_slice %99 {offsets = [0, 64], sizes = [8, 64], strides = [1, 1]} : vector<8x128xf32> to vector<8x64xf32>
    %102 = arith.maximumf %100, %101 : vector<8x64xf32>
    %c0_39 = arith.constant 0 : index
    %c0_40 = arith.constant 0 : index
    %103 = vector.load %arg4[%c0_39, %c0_40] : memref<1x64xf32, #tpu.memory_space<vmem>>, vector<1x64xf32>
    %104 = vector.broadcast %103 : vector<1x64xf32> to vector<8x64xf32>
    %105 = arith.addf %102, %104 : vector<8x64xf32>
    %cst_41 = arith.constant 0.00999999977 : f32
    %106 = vector.broadcast %cst_41 : f32 to vector<8x64xf32>
    %107 = arith.mulf %106, %105 : vector<8x64xf32>
    %108 = arith.maximumf %105, %107 : vector<8x64xf32>
    %109 = vector.extract_strided_slice %23 {offsets = [112, 0], sizes = [8, 128], strides = [1, 1]} : vector<128x128xf32> to vector<8x128xf32>
    %110 = vector.extract_strided_slice %23 {offsets = [120, 0], sizes = [8, 128], strides = [1, 1]} : vector<128x128xf32> to vector<8x128xf32>
    %111 = arith.maximumf %109, %110 : vector<8x128xf32>
    %112 = vector.extract_strided_slice %111 {offsets = [0, 0], sizes = [8, 64], strides = [1, 1]} : vector<8x128xf32> to vector<8x64xf32>
    %113 = vector.extract_strided_slice %111 {offsets = [0, 64], sizes = [8, 64], strides = [1, 1]} : vector<8x128xf32> to vector<8x64xf32>
    %114 = arith.maximumf %112, %113 : vector<8x64xf32>
    %c0_42 = arith.constant 0 : index
    %c0_43 = arith.constant 0 : index
    %115 = vector.load %arg4[%c0_42, %c0_43] : memref<1x64xf32, #tpu.memory_space<vmem>>, vector<1x64xf32>
    %116 = vector.broadcast %115 : vector<1x64xf32> to vector<8x64xf32>
    %117 = arith.addf %114, %116 : vector<8x64xf32>
    %cst_44 = arith.constant 0.00999999977 : f32
    %118 = vector.broadcast %cst_44 : f32 to vector<8x64xf32>
    %119 = arith.mulf %118, %117 : vector<8x64xf32>
    %120 = arith.maximumf %117, %119 : vector<8x64xf32>
    %121 = tpu.concatenate %24, %36, %48, %60, %72, %84, %96, %108, %120, %24 in 0 : vector<8x64xf32>, vector<8x64xf32>, vector<8x64xf32>, vector<8x64xf32>, vector<8x64xf32>, vector<8x64xf32>, vector<8x64xf32>, vector<8x64xf32>, vector<8x64xf32>, vector<8x64xf32> -> vector<80x64xf32>
    %122 = vector.extract_strided_slice %121 {offsets = [0, 0], sizes = [64, 64], strides = [1, 1]} : vector<80x64xf32> to vector<64x64xf32>
    %c0_45 = arith.constant 0 : index
    %c0_46 = arith.constant 0 : index
    %c0_47 = arith.constant 0 : index
    %123 = vector.load %arg5[%c0_45, %c0_46, %c0_47] : memref<3x64x32xf32, #tpu.memory_space<vmem>>, vector<1x64x32xf32>
    %124 = vector.shape_cast %123 : vector<1x64x32xf32> to vector<64x32xf32>
    %cst_48 = arith.constant dense<0.000000e+00> : vector<64x32xf32>
    %125 = tpu.matmul %122, %124, %cst_48 {dimension_numbers = #tpu.dot_dimension_numbers<[1], [0], [0], [1], [0, 0, 1, 1], [], []>} : vector<64x64xf32>, vector<64x32xf32>, vector<64x32xf32> -> vector<64x32xf32>
    %126 = vector.extract_strided_slice %121 {offsets = [8, 0], sizes = [64, 64], strides = [1, 1]} : vector<80x64xf32> to vector<64x64xf32>
    %c1_49 = arith.constant 1 : index
    %c0_50 = arith.constant 0 : index
    %c0_51 = arith.constant 0 : index
    %127 = vector.load %arg5[%c1_49, %c0_50, %c0_51] : memref<3x64x32xf32, #tpu.memory_space<vmem>>, vector<1x64x32xf32>
    %128 = vector.shape_cast %127 : vector<1x64x32xf32> to vector<64x32xf32>
    %cst_52 = arith.constant dense<0.000000e+00> : vector<64x32xf32>
    %129 = tpu.matmul %126, %128, %cst_52 {dimension_numbers = #tpu.dot_dimension_numbers<[1], [0], [0], [1], [0, 0, 1, 1], [], []>} : vector<64x64xf32>, vector<64x32xf32>, vector<64x32xf32> -> vector<64x32xf32>
    %130 = arith.addf %125, %129 : vector<64x32xf32>
    %131 = vector.extract_strided_slice %121 {offsets = [16, 0], sizes = [64, 64], strides = [1, 1]} : vector<80x64xf32> to vector<64x64xf32>
    %c2_53 = arith.constant 2 : index
    %c0_54 = arith.constant 0 : index
    %c0_55 = arith.constant 0 : index
    %132 = vector.load %arg5[%c2_53, %c0_54, %c0_55] : memref<3x64x32xf32, #tpu.memory_space<vmem>>, vector<1x64x32xf32>
    %133 = vector.shape_cast %132 : vector<1x64x32xf32> to vector<64x32xf32>
    %cst_56 = arith.constant dense<0.000000e+00> : vector<64x32xf32>
    %134 = tpu.matmul %131, %133, %cst_56 {dimension_numbers = #tpu.dot_dimension_numbers<[1], [0], [0], [1], [0, 0, 1, 1], [], []>} : vector<64x64xf32>, vector<64x32xf32>, vector<64x32xf32> -> vector<64x32xf32>
    %135 = arith.addf %130, %134 : vector<64x32xf32>
    %136 = vector.extract_strided_slice %135 {offsets = [0, 0], sizes = [8, 32], strides = [1, 1]} : vector<64x32xf32> to vector<8x32xf32>
    %137 = vector.extract_strided_slice %135 {offsets = [8, 0], sizes = [8, 32], strides = [1, 1]} : vector<64x32xf32> to vector<8x32xf32>
    %138 = arith.maximumf %136, %137 : vector<8x32xf32>
    %139 = vector.extract_strided_slice %138 {offsets = [0, 0], sizes = [8, 16], strides = [1, 1]} : vector<8x32xf32> to vector<8x16xf32>
    %140 = vector.extract_strided_slice %138 {offsets = [0, 16], sizes = [8, 16], strides = [1, 1]} : vector<8x32xf32> to vector<8x16xf32>
    %141 = arith.maximumf %139, %140 : vector<8x16xf32>
    %c0_57 = arith.constant 0 : index
    %c0_58 = arith.constant 0 : index
    %142 = vector.load %arg6[%c0_57, %c0_58] : memref<1x16xf32, #tpu.memory_space<vmem>>, vector<1x16xf32>
    %143 = vector.broadcast %142 : vector<1x16xf32> to vector<8x16xf32>
    %144 = arith.addf %141, %143 : vector<8x16xf32>
    %cst_59 = arith.constant 0.00999999977 : f32
    %145 = vector.broadcast %cst_59 : f32 to vector<8x16xf32>
    %146 = arith.mulf %145, %144 : vector<8x16xf32>
    %147 = arith.maximumf %144, %146 : vector<8x16xf32>
    %c0_60 = arith.constant 0 : index
    %c0_61 = arith.constant 0 : index
    %c0_62 = arith.constant 0 : index
    %148 = vector.load %arg7[%c0_60, %c0_61, %c0_62] : memref<4x16x32xf32, #tpu.memory_space<vmem>>, vector<1x16x32xf32>
    %149 = vector.shape_cast %148 : vector<1x16x32xf32> to vector<16x32xf32>
    %cst_63 = arith.constant dense<0.000000e+00> : vector<8x32xf32>
    %150 = tpu.matmul %147, %149, %cst_63 {dimension_numbers = #tpu.dot_dimension_numbers<[1], [0], [0], [1], [0, 0, 1, 1], [], []>} : vector<8x16xf32>, vector<16x32xf32>, vector<8x32xf32> -> vector<8x32xf32>
    %151 = vector.extract_strided_slice %135 {offsets = [16, 0], sizes = [8, 32], strides = [1, 1]} : vector<64x32xf32> to vector<8x32xf32>
    %152 = vector.extract_strided_slice %135 {offsets = [24, 0], sizes = [8, 32], strides = [1, 1]} : vector<64x32xf32> to vector<8x32xf32>
    %153 = arith.maximumf %151, %152 : vector<8x32xf32>
    %154 = vector.extract_strided_slice %153 {offsets = [0, 0], sizes = [8, 16], strides = [1, 1]} : vector<8x32xf32> to vector<8x16xf32>
    %155 = vector.extract_strided_slice %153 {offsets = [0, 16], sizes = [8, 16], strides = [1, 1]} : vector<8x32xf32> to vector<8x16xf32>
    %156 = arith.maximumf %154, %155 : vector<8x16xf32>
    %c0_64 = arith.constant 0 : index
    %c0_65 = arith.constant 0 : index
    %157 = vector.load %arg6[%c0_64, %c0_65] : memref<1x16xf32, #tpu.memory_space<vmem>>, vector<1x16xf32>
    %158 = vector.broadcast %157 : vector<1x16xf32> to vector<8x16xf32>
    %159 = arith.addf %156, %158 : vector<8x16xf32>
    %cst_66 = arith.constant 0.00999999977 : f32
    %160 = vector.broadcast %cst_66 : f32 to vector<8x16xf32>
    %161 = arith.mulf %160, %159 : vector<8x16xf32>
    %162 = arith.maximumf %159, %161 : vector<8x16xf32>
    %c1_67 = arith.constant 1 : index
    %c0_68 = arith.constant 0 : index
    %c0_69 = arith.constant 0 : index
    %163 = vector.load %arg7[%c1_67, %c0_68, %c0_69] : memref<4x16x32xf32, #tpu.memory_space<vmem>>, vector<1x16x32xf32>
    %164 = vector.shape_cast %163 : vector<1x16x32xf32> to vector<16x32xf32>
    %cst_70 = arith.constant dense<0.000000e+00> : vector<8x32xf32>
    %165 = tpu.matmul %162, %164, %cst_70 {dimension_numbers = #tpu.dot_dimension_numbers<[1], [0], [0], [1], [0, 0, 1, 1], [], []>} : vector<8x16xf32>, vector<16x32xf32>, vector<8x32xf32> -> vector<8x32xf32>
    %166 = arith.addf %150, %165 : vector<8x32xf32>
    %167 = vector.extract_strided_slice %135 {offsets = [32, 0], sizes = [8, 32], strides = [1, 1]} : vector<64x32xf32> to vector<8x32xf32>
    %168 = vector.extract_strided_slice %135 {offsets = [40, 0], sizes = [8, 32], strides = [1, 1]} : vector<64x32xf32> to vector<8x32xf32>
    %169 = arith.maximumf %167, %168 : vector<8x32xf32>
    %170 = vector.extract_strided_slice %169 {offsets = [0, 0], sizes = [8, 16], strides = [1, 1]} : vector<8x32xf32> to vector<8x16xf32>
    %171 = vector.extract_strided_slice %169 {offsets = [0, 16], sizes = [8, 16], strides = [1, 1]} : vector<8x32xf32> to vector<8x16xf32>
    %172 = arith.maximumf %170, %171 : vector<8x16xf32>
    %c0_71 = arith.constant 0 : index
    %c0_72 = arith.constant 0 : index
    %173 = vector.load %arg6[%c0_71, %c0_72] : memref<1x16xf32, #tpu.memory_space<vmem>>, vector<1x16xf32>
    %174 = vector.broadcast %173 : vector<1x16xf32> to vector<8x16xf32>
    %175 = arith.addf %172, %174 : vector<8x16xf32>
    %cst_73 = arith.constant 0.00999999977 : f32
    %176 = vector.broadcast %cst_73 : f32 to vector<8x16xf32>
    %177 = arith.mulf %176, %175 : vector<8x16xf32>
    %178 = arith.maximumf %175, %177 : vector<8x16xf32>
    %c2_74 = arith.constant 2 : index
    %c0_75 = arith.constant 0 : index
    %c0_76 = arith.constant 0 : index
    %179 = vector.load %arg7[%c2_74, %c0_75, %c0_76] : memref<4x16x32xf32, #tpu.memory_space<vmem>>, vector<1x16x32xf32>
    %180 = vector.shape_cast %179 : vector<1x16x32xf32> to vector<16x32xf32>
    %cst_77 = arith.constant dense<0.000000e+00> : vector<8x32xf32>
    %181 = tpu.matmul %178, %180, %cst_77 {dimension_numbers = #tpu.dot_dimension_numbers<[1], [0], [0], [1], [0, 0, 1, 1], [], []>} : vector<8x16xf32>, vector<16x32xf32>, vector<8x32xf32> -> vector<8x32xf32>
    %182 = arith.addf %166, %181 : vector<8x32xf32>
    %183 = vector.extract_strided_slice %135 {offsets = [48, 0], sizes = [8, 32], strides = [1, 1]} : vector<64x32xf32> to vector<8x32xf32>
    %184 = vector.extract_strided_slice %135 {offsets = [56, 0], sizes = [8, 32], strides = [1, 1]} : vector<64x32xf32> to vector<8x32xf32>
    %185 = arith.maximumf %183, %184 : vector<8x32xf32>
    %186 = vector.extract_strided_slice %185 {offsets = [0, 0], sizes = [8, 16], strides = [1, 1]} : vector<8x32xf32> to vector<8x16xf32>
    %187 = vector.extract_strided_slice %185 {offsets = [0, 16], sizes = [8, 16], strides = [1, 1]} : vector<8x32xf32> to vector<8x16xf32>
    %188 = arith.maximumf %186, %187 : vector<8x16xf32>
    %c0_78 = arith.constant 0 : index
    %c0_79 = arith.constant 0 : index
    %189 = vector.load %arg6[%c0_78, %c0_79] : memref<1x16xf32, #tpu.memory_space<vmem>>, vector<1x16xf32>
    %190 = vector.broadcast %189 : vector<1x16xf32> to vector<8x16xf32>
    %191 = arith.addf %188, %190 : vector<8x16xf32>
    %cst_80 = arith.constant 0.00999999977 : f32
    %192 = vector.broadcast %cst_80 : f32 to vector<8x16xf32>
    %193 = arith.mulf %192, %191 : vector<8x16xf32>
    %194 = arith.maximumf %191, %193 : vector<8x16xf32>
    %c3_81 = arith.constant 3 : index
    %c0_82 = arith.constant 0 : index
    %c0_83 = arith.constant 0 : index
    %195 = vector.load %arg7[%c3_81, %c0_82, %c0_83] : memref<4x16x32xf32, #tpu.memory_space<vmem>>, vector<1x16x32xf32>
    %196 = vector.shape_cast %195 : vector<1x16x32xf32> to vector<16x32xf32>
    %cst_84 = arith.constant dense<0.000000e+00> : vector<8x32xf32>
    %197 = tpu.matmul %194, %196, %cst_84 {dimension_numbers = #tpu.dot_dimension_numbers<[1], [0], [0], [1], [0, 0, 1, 1], [], []>} : vector<8x16xf32>, vector<16x32xf32>, vector<8x32xf32> -> vector<8x32xf32>
    %198 = arith.addf %182, %197 : vector<8x32xf32>
    %c0_85 = arith.constant 0 : index
    %c0_86 = arith.constant 0 : index
    %199 = vector.load %arg8[%c0_85, %c0_86] : memref<1x32xf32, #tpu.memory_space<vmem>>, vector<1x32xf32>
    %200 = vector.broadcast %199 : vector<1x32xf32> to vector<8x32xf32>
    %201 = arith.addf %198, %200 : vector<8x32xf32>
    %cst_87 = arith.constant 0.00999999977 : f32
    %202 = vector.broadcast %cst_87 : f32 to vector<8x32xf32>
    %203 = arith.mulf %202, %201 : vector<8x32xf32>
    %204 = arith.maximumf %201, %203 : vector<8x32xf32>
    %c0_88 = arith.constant 0 : index
    %c0_89 = arith.constant 0 : index
    %205 = vector.load %arg9[%c0_88, %c0_89] : memref<32x16xf32, #tpu.memory_space<vmem>>, vector<32x16xf32>
    %cst_90 = arith.constant dense<0.000000e+00> : vector<8x16xf32>
    %206 = tpu.matmul %204, %205, %cst_90 {dimension_numbers = #tpu.dot_dimension_numbers<[1], [0], [0], [1], [0, 0, 1, 1], [], []>} : vector<8x32xf32>, vector<32x16xf32>, vector<8x16xf32> -> vector<8x16xf32>
    %c0_91 = arith.constant 0 : index
    %c0_92 = arith.constant 0 : index
    %207 = vector.load %arg10[%c0_91, %c0_92] : memref<1x16xf32, #tpu.memory_space<vmem>>, vector<1x16xf32>
    %208 = vector.broadcast %207 : vector<1x16xf32> to vector<8x16xf32>
    %209 = arith.addf %206, %208 : vector<8x16xf32>
    %cst_93 = arith.constant 0.00999999977 : f32
    %210 = vector.broadcast %cst_93 : f32 to vector<8x16xf32>
    %211 = arith.mulf %210, %209 : vector<8x16xf32>
    %212 = arith.maximumf %209, %211 : vector<8x16xf32>
    %c0_94 = arith.constant 0 : index
    %c0_95 = arith.constant 0 : index
    %213 = vector.load %arg2[%c0_94, %c0_95] : memref<8x1xf32, #tpu.memory_space<vmem>>, vector<8x1xf32>
    %c0_96 = arith.constant 0 : index
    %c0_97 = arith.constant 0 : index
    %214 = vector.load %arg11[%c0_96, %c0_97] : memref<1x1xf32, #tpu.memory_space<vmem>>, vector<1x1xf32>
    %215 = vector.broadcast %214 : vector<1x1xf32> to vector<8x1xf32>
    %216 = arith.mulf %213, %215 : vector<8x1xf32>
    %c0_98 = arith.constant 0 : index
    %c0_99 = arith.constant 0 : index
    %217 = vector.load %arg12[%c0_98, %c0_99] : memref<1x1xf32, #tpu.memory_space<vmem>>, vector<1x1xf32>
    %218 = vector.broadcast %217 : vector<1x1xf32> to vector<8x1xf32>
    %219 = arith.addf %216, %218 : vector<8x1xf32>
    %220 = arith.negf %219 : vector<8x1xf32>
    %221 = math.exp %220 : vector<8x1xf32>
    %cst_100 = arith.constant 1.000000e+00 : f32
    %222 = vector.broadcast %cst_100 : f32 to vector<8x1xf32>
    %223 = arith.addf %222, %221 : vector<8x1xf32>
    %224 = arith.divf %222, %223 : vector<8x1xf32>
    %c0_101 = arith.constant 0 : index
    %c0_102 = arith.constant 0 : index
    %225 = vector.load %arg13[%c0_101, %c0_102] : memref<16x2xf32, #tpu.memory_space<vmem>>, vector<16x2xf32>
    %cst_103 = arith.constant dense<0.000000e+00> : vector<8x2xf32>
    %226 = tpu.matmul %212, %225, %cst_103 {dimension_numbers = #tpu.dot_dimension_numbers<[1], [0], [0], [1], [0, 0, 1, 1], [], []>} : vector<8x16xf32>, vector<16x2xf32>, vector<8x2xf32> -> vector<8x2xf32>
    %c0_104 = arith.constant 0 : index
    %c0_105 = arith.constant 0 : index
    %227 = vector.load %arg14[%c0_104, %c0_105] : memref<1x2xf32, #tpu.memory_space<vmem>>, vector<1x2xf32>
    %228 = vector.broadcast %224 : vector<8x1xf32> to vector<8x2xf32>
    %229 = vector.broadcast %227 : vector<1x2xf32> to vector<8x2xf32>
    %230 = arith.mulf %228, %229 : vector<8x2xf32>
    %231 = arith.addf %226, %230 : vector<8x2xf32>
    %c0_106 = arith.constant 0 : index
    %c0_107 = arith.constant 0 : index
    %232 = vector.load %arg15[%c0_106, %c0_107] : memref<1x2xf32, #tpu.memory_space<vmem>>, vector<1x2xf32>
    %233 = vector.broadcast %232 : vector<1x2xf32> to vector<8x2xf32>
    %234 = arith.addf %231, %233 : vector<8x2xf32>
    %235 = arith.negf %234 : vector<8x2xf32>
    %236 = math.exp %235 : vector<8x2xf32>
    %cst_108 = arith.constant 1.000000e+00 : f32
    %237 = vector.broadcast %cst_108 : f32 to vector<8x2xf32>
    %238 = arith.addf %237, %236 : vector<8x2xf32>
    %239 = arith.divf %237, %238 : vector<8x2xf32>
    %c0_109 = arith.constant 0 : index
    %c0_110 = arith.constant 0 : index
    %240 = vector.load %arg16[%c0_109, %c0_110] : memref<8x2xf32, #tpu.memory_space<vmem>>, vector<8x2xf32>
    tpu.vector_store %arg16[%c0_109, %c0_110], %239 {strides = array<i32>} : memref<8x2xf32, #tpu.memory_space<vmem>>, vector<8x2xf32>,
    return
  }
  func.func @transform_0(%arg0: i32) -> (i32, i32) {
    %c0_i32 = arith.constant 0 : i32
    %c0_i32_0 = arith.constant 0 : i32
    return %arg0, %c0_i32 : i32, i32
  }
  func.func @transform_1(%arg0: i32) -> (i32, i32) {
    %c0_i32 = arith.constant 0 : i32
    %c0_i32_0 = arith.constant 0 : i32
    return %arg0, %c0_i32 : i32, i32
  }
  func.func @transform_2(%arg0: i32) -> (i32, i32, i32) {
    %c0_i32 = arith.constant 0 : i32
    %c0_i32_0 = arith.constant 0 : i32
    %c0_i32_1 = arith.constant 0 : i32
    %c0_i32_2 = arith.constant 0 : i32
    return %c0_i32, %c0_i32_0, %c0_i32_1 : i32, i32, i32
  }
  func.func @transform_3(%arg0: i32) -> (i32, i32) {
    %c0_i32 = arith.constant 0 : i32
    %c0_i32_0 = arith.constant 0 : i32
    %c0_i32_1 = arith.constant 0 : i32
    return %c0_i32, %c0_i32_0 : i32, i32
  }
  func.func @transform_4(%arg0: i32) -> (i32, i32, i32) {
    %c0_i32 = arith.constant 0 : i32
    %c0_i32_0 = arith.constant 0 : i32
    %c0_i32_1 = arith.constant 0 : i32
    %c0_i32_2 = arith.constant 0 : i32
    return %c0_i32, %c0_i32_0, %c0_i32_1 : i32, i32, i32
  }
  func.func @transform_5(%arg0: i32) -> (i32, i32) {
    %c0_i32 = arith.constant 0 : i32
    %c0_i32_0 = arith.constant 0 : i32
    %c0_i32_1 = arith.constant 0 : i32
    return %c0_i32, %c0_i32_0 : i32, i32
  }
  func.func @transform_6(%arg0: i32) -> (i32, i32, i32) {
    %c0_i32 = arith.constant 0 : i32
    %c0_i32_0 = arith.constant 0 : i32
    %c0_i32_1 = arith.constant 0 : i32
    %c0_i32_2 = arith.constant 0 : i32
    return %c0_i32, %c0_i32_0, %c0_i32_1 : i32, i32, i32
  }
  func.func @transform_7(%arg0: i32) -> (i32, i32) {
    %c0_i32 = arith.constant 0 : i32
    %c0_i32_0 = arith.constant 0 : i32
    %c0_i32_1 = arith.constant 0 : i32
    return %c0_i32, %c0_i32_0 : i32, i32
  }
  func.func @transform_8(%arg0: i32) -> (i32, i32) {
    %c0_i32 = arith.constant 0 : i32
    %c0_i32_0 = arith.constant 0 : i32
    %c0_i32_1 = arith.constant 0 : i32
    return %c0_i32, %c0_i32_0 : i32, i32
  }
  func.func @transform_9(%arg0: i32) -> (i32, i32) {
    %c0_i32 = arith.constant 0 : i32
    %c0_i32_0 = arith.constant 0 : i32
    %c0_i32_1 = arith.constant 0 : i32
    return %c0_i32, %c0_i32_0 : i32, i32
  }
  func.func @transform_10(%arg0: i32) -> (i32, i32) {
    %c0_i32 = arith.constant 0 : i32
    %c0_i32_0 = arith.constant 0 : i32
    %c0_i32_1 = arith.constant 0 : i32
    return %c0_i32, %c0_i32_0 : i32, i32
  }
  func.func @transform_11(%arg0: i32) -> (i32, i32) {
    %c0_i32 = arith.constant 0 : i32
    %c0_i32_0 = arith.constant 0 : i32
    %c0_i32_1 = arith.constant 0 : i32
    return %c0_i32, %c0_i32_0 : i32, i32
  }
  func.func @transform_12(%arg0: i32) -> (i32, i32) {
    %c0_i32 = arith.constant 0 : i32
    %c0_i32_0 = arith.constant 0 : i32
    %c0_i32_1 = arith.constant 0 : i32
    return %c0_i32, %c0_i32_0 : i32, i32
  }
  func.func @transform_13(%arg0: i32) -> (i32, i32) {
    %c0_i32 = arith.constant 0 : i32
    %c0_i32_0 = arith.constant 0 : i32
    %c0_i32_1 = arith.constant 0 : i32
    return %c0_i32, %c0_i32_0 : i32, i32
  }
  func.func @transform_14(%arg0: i32) -> (i32, i32) {
    %c0_i32 = arith.constant 0 : i32
    %c0_i32_0 = arith.constant 0 : i32
    %c0_i32_1 = arith.constant 0 : i32
    return %c0_i32, %c0_i32_0 : i32, i32
  }
  func.func @transform_15(%arg0: i32) -> (i32, i32) {
    %c0_i32 = arith.constant 0 : i32
    %c0_i32_0 = arith.constant 0 : i32
    return %arg0, %c0_i32 : i32, i32
  }
}

</mosaic_0001>

<bundles_post_ra>
// kernel: tile.13
= control target key start
LH: loop header
LB: loop body
LE: loop exit
PB: predicated region body
PF: predicated region fallthrough
CT: control target
= control target key end

     0   :  { %s22_s0 = inlined_call_operand.vmem [shape: f32[8], index: 0, kind: input, shape index: {}]   ;;  %s23_s1 = inlined_call_operand.vmem [shape: f32[8,8], index: 1, kind: output, shape index: {}]  }
   0x1   :  { %v4_v0 = vld [vmem:[%s22_s0] ss:$0 sm:$0xff] }
   0x2   :  { %5 = vst [vmem:[%s23_s1] sm:$0xff] %v4_v0 }

// kernel: tile.14
= control target key start
LH: loop header
LB: loop body
LE: loop exit
PB: predicated region body
PF: predicated region fallthrough
CT: control target
= control target key end

     0   :  { %s69_s10 = smov 56   ;;  %s70_s11 = smov 40   ;;  %vm3_vm0 = vcmask 64512   ;;  %vm9_vm1 = vcmask 523712   ;;  %vm15_vm2 = vcmask 458112   ;;  %vm21_vm3 = vcmask 392512   ;;  %s113_s0 = inlined_call_operand.vmem [shape: f32[8,8], index: 0, kind: input, shape index: {}]   ;;  %s114_s1 = inlined_call_operand.vmem [shape: f32[1,64], index: 1, kind: output, shape index: {}]  }
   0x1   :  { %v55_v0 = vld [vmem:[%s113_s0 + $0x7] sm:$0x1]   ;;  %v57_v1 = vld [vmem:[%s113_s0 + $0x5] sm:$0x1]   ;;  %v56_v2 = vld [vmem:[%s113_s0 + $0x6] sm:$0x1]  }
   0x2   :  { %7 = vrot.lane.b32.xlu0 %v55_v0, %s69_s10  ;;  %19 = vrot.lane.b32.xlu1 %v57_v1, %s70_s11  ;;  %v58_v3 = vld [vmem:[%s113_s0 + $0x4] sm:$0x1]   ;;  %v2_v4 = vld [vmem:[%s113_s0] sm:$0x1]   ;;  %s71_s18 = smov 48   ;;  %s72_s19 = smov 32  }
   0x3   :  { %4 = vst.msk [vmem:[#allocation0] sm:$0x1] %vm3_vm0, %v2_v4   ;;  %v59_v5 = vld [vmem:[%s113_s0 + $0x3] sm:$0x1]   ;;  %v60_v6 = vld [vmem:[%s113_s0 + $0x2] sm:$0x1]  }
   0x4   :  { %s73_s24 = smov 24   ;;  %s74_s25 = smov 16   ;;  %v61_v7 = vld [vmem:[%s113_s0 + $0x1] sm:$0x1]   ;;  %vm27_vm4 = vcmask 326912   ;;  %vm33_vm5 = vcmask 261312  }
   0x5   :  { %s75_s0 = smov 8   ;;  %vm39_vm6 = vcmask 195712   ;;  %vm45_vm7 = vcmask 130112  }
   0x6   :  { %13 = vrot.lane.b32.xlu0 %v56_v2, %s71_s18  ;;  %25 = vrot.lane.b32.xlu1 %v58_v3, %s72_s19 }
   0xa   :  { %31 = vrot.lane.b32.xlu0 %v59_v5, %s73_s24  ;;  %37 = vrot.lane.b32.xlu1 %v60_v6, %s74_s25 }
   0xe   :  { %43 = vrot.lane.b32.xlu0 %v61_v7, %s75_s0 }
  0x74   :  { %v8_v8 = vpop.permute.xlu0 %7   ;;  %v20_v9 = vpop.permute.xlu1 %19  }
  0x75   :  { %10 = vst.msk [vmem:[#allocation0] sm:$0x1] %vm9_vm1, %v8_v8  }
  0x78   :  { %v14_v10 = vpop.permute.xlu0 %13   ;;  %v26_v11 = vpop.permute.xlu1 %25  }
  0x79   :  { %16 = vst.msk [vmem:[#allocation0] sm:$0x1] %vm15_vm2, %v14_v10  }
  0x7a   :  { %22 = vst.msk [vmem:[#allocation0] sm:$0x1] %vm21_vm3, %v20_v9  }
  0x7b   :  { %28 = vst.msk [vmem:[#allocation0] sm:$0x1] %vm27_vm4, %v26_v11  }
  0x7c   :  { %v32_v12 = vpop.permute.xlu0 %31   ;;  %v38_v13 = vpop.permute.xlu1 %37  }
  0x7d   :  { %34 = vst.msk [vmem:[#allocation0] sm:$0x1] %vm33_vm5, %v32_v12  }
  0x7e   :  { %40 = vst.msk [vmem:[#allocation0] sm:$0x1] %vm39_vm6, %v38_v13  }
  0x80   :  { %v44_v14 = vpop.permute.xlu0 %43  }
  0x81   :  { %46 = vst.msk [vmem:[#allocation0] sm:$0x1] %vm45_vm7, %v44_v14  }
  0x88   :  { %v51_v15 = vld [vmem:[#allocation0] sm:$0x1] }
  0x89   :  { %54 = vst [vmem:[%s114_s1] sm:$0x1] %v51_v15 }

// kernel: tile.18
= control target key start
LH: loop header
LB: loop body
LE: loop exit
PB: predicated region body
PF: predicated region fallthrough
CT: control target
= control target key end

     0   :  { %s22_s0 = inlined_call_operand.vmem [shape: f32[4], index: 0, kind: input, shape index: {}]   ;;  %s23_s1 = inlined_call_operand.vmem [shape: f32[4,4], index: 1, kind: output, shape index: {}]  }
   0x1   :  { %v4_v0 = vld [vmem:[%s22_s0] ss:$0 sm:$0xff] }
   0x2   :  { %5 = vst [vmem:[%s23_s1] sm:$0xf] %v4_v0 }

// kernel: tile.19
= control target key start
LH: loop header
LB: loop body
LE: loop exit
PB: predicated region body
PF: predicated region fallthrough
CT: control target
= control target key end

     0   :  { %vm8_vm0 = vcmask 31744   ;;  %s40_s8 = smov 4   ;;  %s41_s9 = smov 8   ;;  %vm14_vm1 = vcmask 130144   ;;  %vm20_vm2 = vcmask 97344   ;;  %vm26_vm3 = vcmask 64544   ;;  %s58_s0 = inlined_call_operand.vmem [shape: f32[4,4], index: 0, kind: input, shape index: {}]   ;;  %s59_s1 = inlined_call_operand.vmem [shape: f32[1,16], index: 1, kind: output, shape index: {}]  }
   0x1   :  { %v5_v0 = vld [vmem:[%s58_s0] sm:$0xf]  ;;  %s39_s0 = smov 12  }
   0x2   :  { %6 = vst [vmem:[#allocation1] sm:$0xf] %v5_v0 }
   0x9   :  { %v11_v1 = vld [vmem:[#allocation1 + $0x3] sm:$0x1]   ;;  %v23_v2 = vld [vmem:[#allocation1 + $0x1] sm:$0x1]   ;;  %v7_v3 = vld [vmem:[#allocation1] sm:$0x1]  }
   0xa   :  { %12 = vrot.lane.b32.xlu0 %v11_v1, %s39_s0  ;;  %24 = vrot.lane.b32.xlu1 %v23_v2, %s40_s8  ;;  %v17_v4 = vld [vmem:[#allocation1 + $0x2] sm:$0x1]   ;;  %9 = vst.msk [vmem:[#allocation0] sm:$0x1] %vm8_vm0, %v7_v3  }
   0xe   :  { %18 = vrot.lane.b32.xlu0 %v17_v4, %s41_s9 }
  0x7c   :  { %v13_v5 = vpop.permute.xlu0 %12   ;;  %v25_v6 = vpop.permute.xlu1 %24  }
  0x7d   :  { %15 = vst.msk [vmem:[#allocation0] sm:$0x1] %vm14_vm1, %v13_v5  }
  0x80   :  { %v19_v7 = vpop.permute.xlu0 %18  }
  0x81   :  { %21 = vst.msk [vmem:[#allocation0] sm:$0x1] %vm20_vm2, %v19_v7  }
  0x82   :  { %27 = vst.msk [vmem:[#allocation0] sm:$0x1] %vm26_vm3, %v25_v6  }
  0x89   :  { %v32_v8 = vld [vmem:[#allocation0] sm:$0x1] }
  0x8a   :  { %35 = vst [vmem:[%s59_s1] sm:$0x1] %v32_v8 }

// kernel: vitmap_stat_cnn_forward.1
= control target key start
LH: loop header
LB: loop body
LE: loop exit
PB: predicated region body
PF: predicated region fallthrough
CT: control target
= control target key end

     0   :  { %vm76_vm0 = vcmask 130048   ;;  %s2724_s28 = smov 64   ;;  %vm1198_vm1 = vcmask 523264   ;;  %vm2726_vm2 = vmmov 0   ;;  %s2727_s19 = smov 112   ;;  %vm1927_vm3 = vcmask 261120   ;;  %s3446_s2 = inlined_call_operand.vmem [shape: f32[5,16,128], index: 2, kind: input, shape index: {}]   ;;  %s3447_s0 = inlined_call_operand.vmem [shape: f32[160,16], index: 0, kind: input, shape index: {}]   ;;  %s3448_s4 = inlined_call_operand.vmem [shape: f32[3,64,32], index: 4, kind: input, shape index: {}]   ;;  %s3449_s3 = inlined_call_operand.vmem [shape: f32[1,64], index: 3, kind: input, shape index: {}]   ;;  %s3450_s6 = inlined_call_operand.vmem [shape: f32[4,16,32], index: 6, kind: input, shape index: {}]   ;;  %s3451_s5 = inlined_call_operand.vmem [shape: f32[1,16], index: 5, kind: input, shape index: {}]   ;;  %s3452_s8 = inlined_call_operand.vmem [shape: f32[32,16], index: 8, kind: input, shape index: {}]   ;;  %s3453_s7 = inlined_call_operand.vmem [shape: f32[1,32], index: 7, kind: input, shape index: {}]   ;;  %s3454_s12 = inlined_call_operand.vmem [shape: f32[16,2], index: 12, kind: input, shape index: {}]   ;;  %s3455_s10 = inlined_call_operand.<no memory space> [shape: f32[1,1], index: 10, kind: input, shape index: {}]   ;;  %s3456_s11 = inlined_call_operand.<no memory space> [shape: f32[1,1], index: 11, kind: input, shape index: {}]   ;;  %s3457_s1 = inlined_call_operand.vmem [shape: f32[8,1], index: 1, kind: input, shape index: {}]   ;;  %s3458_s9 = inlined_call_operand.vmem [shape: f32[1,16], index: 9, kind: input, shape index: {}]   ;;  %s3459_s13 = inlined_call_operand.vmem [shape: f32[1,2], index: 13, kind: input, shape index: {}]   ;;  %s3460_s14 = inlined_call_operand.vmem [shape: f32[1,2], index: 14, kind: input, shape index: {}]   ;;  %s3461_s15 = inlined_call_operand.vmem [shape: f32[8,2], index: 15, kind: output, shape index: {}]  }
   0x1   :  { %v2135_v0 = vld [vmem:[%s3446_s2 + $0x18] sm:$0xff]  ;;  %v71_v1 = vld [vmem:[%s3446_s2 + $0x8] sm:$0xff]  ;;  %v2134_v2 = vld [vmem:[%s3446_s2 + $0x10] sm:$0xff]  ;;  %vm2128_vm4 = vcmask 15360  }
   0x2   :  { %2440 = vmatprep.subr.mxu0 %v2135_v0  ;;  %2468 = vmatprep.subr.mxu1 %v71_v1  ;;  %v70_v3 = vld [vmem:[%s3446_s2] sm:$0xff]  ;;  %v55_v4 = vld [vmem:[%s3447_s0 + $0x8] sm:$0xff]  ;;  %v2830_v6 = vld [vmem:[%s3447_s0 + $0x10] sm:$0xff] }
   0x3   :  { %2441 = vmatpush3.msra.mxu0 %v2135_v0  ;;  %2469 = vmatpush3.msra.mxu1 %v71_v1  ;;  %v54_v5 = vld [vmem:[%s3447_s0] sm:$0xff]  ;;  %v2169_v7 = vld [vmem:[%s3446_s2 + $0x28] sm:$0xff]  ;;  %v57_v8 = vld [vmem:[%s3447_s0 + $0x18] sm:$0xff] }
   0x4   :  { %2442 = vmatprep.subr.mxu0 %v2134_v2  ;;  %2470 = vmatprep.subr.mxu1 %v70_v3  ;;  %v2168_v9 = vld [vmem:[%s3446_s2 + $0x20] sm:$0xff]  ;;  %v2187_v11 = vld [vmem:[%s3446_s2 + $0x38] sm:$0xff]  ;;  %v2860_v12 = vld [vmem:[%s3447_s0 + $0x28] sm:$0xff] }
   0x5   :  { %2443 = vmatpush3.msra.mxu0 %v2134_v2  ;;  %2444 = vmatprep.mubr.msk.f32.mxu0 %vm76_vm0, %v55_v4  ;;  %v2850_v10 = vld [vmem:[%s3447_s0 + $0x20] sm:$0xff]  ;;  %v2186_v13 = vld [vmem:[%s3446_s2 + $0x30] sm:$0xff]  ;;  %v2205_v14 = vld [vmem:[%s3446_s2 + $0x48] sm:$0xff] }
   0x6   :  { %2471 = vmatpush3.msra.mxu1 %v70_v3  ;;  %2472 = vmatprep.mubr.msk.f32.mxu1 %vm76_vm0, %v54_v5  ;;  %v2878_v15 = vld [vmem:[%s3447_s0 + $0x30] sm:$0xff]  ;;  %v2883_v16 = vld [vmem:[%s3447_s0 + $0x38] sm:$0xff]  ;;  %v2896_v17 = vld [vmem:[%s3447_s0 + $0x40] sm:$0xff] }
   0x7   :  { %2445 = vmatmul.mubr.msk.f32.vlgmr.msra.gmra.mxu0 %vm76_vm0, %v2830_v6  ;;  %2473 = vmatmul.mubr.msk.f32.vlgmr.msra.gmra.mxu1 %vm76_vm0, %v55_v4  ;;  %v2901_v18 = vld [vmem:[%s3447_s0 + $0x48] sm:$0xff]  ;;  %v2914_v19 = vld [vmem:[%s3447_s0 + $0x50] sm:$0xff]  ;;  %v2919_v20 = vld [vmem:[%s3447_s0 + $0x58] sm:$0xff] }
   0x8   :  { %2496 = vmatprep.subr.mxu0 %v2169_v7  ;;  %2447 = vmatprep.mubr.msk.f32.mxu0 %vm76_vm0, %v57_v8  ;;  %v66_v21 = vld [vmem:[%s3447_s0 + $0x60] sm:$0xff]  ;;  %v67_v22 = vld [vmem:[%s3447_s0 + $0x68] sm:$0xff]  ;;  %v68_v23 = vld [vmem:[%s3447_s0 + $0x70] sm:$0xff] }
   0x9   :  { %2497 = vmatpush3.msra.mxu0 %v2169_v7  ;;  %2475 = vmatprep.mubr.msk.f32.mxu1 %vm76_vm0, %v2830_v6  ;;  %v69_v24 = vld [vmem:[%s3447_s0 + $0x78] sm:$0xff]  ;;  %v72_v25 = vld [vmem:[%s3447_s0 + $0x80] sm:$0xff]  ;;  %v433_v27 = vld [vmem:[%s3447_s0 + $0x88] sm:$0xff] }
   0xa   :  { %2498 = vmatprep.subr.mxu0 %v2168_v9  ;;  %2524 = vmatprep.subr.mxu1 %v2187_v11  ;;  %v2204_v26 = vld [vmem:[%s3446_s2 + $0x40] sm:$0xff]  ;;  %v661_v28 = vld [vmem:[%s3447_s0 + $0x90] sm:$0xff]  ;;  %v889_v29 = vld [vmem:[%s3447_s0 + $0x98] sm:$0xff] }
   0xb   :  { %2448 = vmatmul.mubr.msk.f32.gmra.mxu0 %vm76_vm0, %v2850_v10  ;;  %2476 = vmatmul.mubr.msk.f32.gmra.mxu1 %vm76_vm0, %v57_v8  ;;  %v2230_v30 = vld [vmem:[%s3448_s4 + $0x78] sm:$0xff]  ;;  %v2229_v31 = vld [vmem:[%s3448_s4 + $0x70] sm:$0xff] }
   0xc   :  { %2450 = vmatprep.mubr.msk.f32.mxu0 %vm76_vm0, %v2860_v12  ;;  %2478 = vmatprep.mubr.msk.f32.mxu1 %vm76_vm0, %v2850_v10 }
   0xd   :  { %2499 = vmatpush3.msra.mxu0 %v2168_v9  ;;  %2525 = vmatpush3.msra.mxu1 %v2187_v11 }
   0xe   :  { %2526 = vmatprep.subr.mxu1 %v2186_v13  ;;  %2552 = vmatprep.subr.mxu0 %v2205_v14 }
   0xf   :  { %2451 = vmatmul.mubr.msk.f32.gmra.mxu0 %vm76_vm0, %v2878_v15  ;;  %2479 = vmatmul.mubr.msk.f32.gmra.mxu1 %vm76_vm0, %v2860_v12 }
  0x10   :  { %2453 = vmatprep.mubr.msk.f32.mxu0 %vm76_vm0, %v2883_v16  ;;  %2481 = vmatprep.mubr.msk.f32.mxu1 %vm76_vm0, %v2878_v15 }
  0x11   :  { %2527 = vmatpush3.msra.mxu1 %v2186_v13 }
  0x12   :  { %2580 = vmatprep.subr.mxu1 %v2230_v30 }
  0x13   :  { %2454 = vmatmul.mubr.msk.f32.gmra.mxu0 %vm76_vm0, %v2896_v17  ;;  %2482 = vmatmul.mubr.msk.f32.gmra.mxu1 %vm76_vm0, %v2883_v16 }
  0x14   :  { %2456 = vmatprep.mubr.msk.f32.mxu0 %vm76_vm0, %v2901_v18  ;;  %2484 = vmatprep.mubr.msk.f32.mxu1 %vm76_vm0, %v2896_v17 }
  0x17   :  { %2457 = vmatmul.mubr.msk.f32.gmra.mxu0 %vm76_vm0, %v2914_v19  ;;  %2485 = vmatmul.mubr.msk.f32.gmra.mxu1 %vm76_vm0, %v2901_v18 }
  0x18   :  { %2459 = vmatprep.mubr.msk.f32.mxu0 %vm76_vm0, %v2919_v20  ;;  %2487 = vmatprep.mubr.msk.f32.mxu1 %vm76_vm0, %v2914_v19 }
  0x1b   :  { %2460 = vmatmul.mubr.msk.f32.gmra.mxu0 %vm76_vm0, %v66_v21  ;;  %2488 = vmatmul.mubr.msk.f32.gmra.mxu1 %vm76_vm0, %v2919_v20 }
  0x1c   :  { %2462 = vmatprep.mubr.msk.f32.mxu0 %vm76_vm0, %v67_v22  ;;  %2490 = vmatprep.mubr.msk.f32.mxu1 %vm76_vm0, %v66_v21 }
  0x1f   :  { %2463 = vmatmul.mubr.msk.f32.gmra.mxu0 %vm76_vm0, %v68_v23  ;;  %2491 = vmatmul.mubr.msk.f32.gmra.mxu1 %vm76_vm0, %v67_v22 }
  0x20   :  { %2465 = vmatprep.mubr.msk.f32.mxu0 %vm76_vm0, %v69_v24  ;;  %2493 = vmatprep.mubr.msk.f32.mxu1 %vm76_vm0, %v68_v23 }
  0x23   :  { %2466 = vmatmul.mubr.msk.f32.gmra.mxu0 %vm76_vm0, %v72_v25  ;;  %2494 = vmatmul.mubr.msk.f32.gmra.mxu1 %vm76_vm0, %v69_v24 }
  0x24   :  { %2500 = vmatprep.mubr.msk.f32.mxu0 %vm76_vm0, %v2830_v6  ;;  %2528 = vmatprep.mubr.msk.f32.mxu1 %vm76_vm0, %v57_v8 }
  0x27   :  { %2501 = vmatmul.mubr.msk.f32.vlgmr.msra.gmra.mxu0 %vm76_vm0, %v57_v8  ;;  %2529 = vmatmul.mubr.msk.f32.vlgmr.msra.gmra.mxu1 %vm76_vm0, %v2850_v10 }
  0x28   :  { %2553 = vmatpush3.msra.mxu0 %v2205_v14  ;;  %2503 = vmatprep.mubr.msk.f32.mxu0 %vm76_vm0, %v2850_v10 }
  0x29   :  { %2531 = vmatprep.mubr.msk.f32.mxu1 %vm76_vm0, %v2860_v12  ;;  %2554 = vmatprep.subr.mxu0 %v2204_v26 }
  0x2a   :  { %2555 = vmatpush3.msra.mxu0 %v2204_v26  ;;  %2581 = vmatpush3.msra.mxu1 %v2230_v30  ;;  %v2227_v26 = vld [vmem:[%s3448_s4 + $0x60] sm:$0xff] }
  0x2b   :  { %2504 = vmatmul.mubr.msk.f32.gmra.mxu0 %vm76_vm0, %v2860_v12  ;;  %2532 = vmatmul.mubr.msk.f32.gmra.mxu1 %vm76_vm0, %v2878_v15 }
  0x2c   :  { %2506 = vmatprep.mubr.msk.f32.mxu0 %vm76_vm0, %v2878_v15  ;;  %2534 = vmatprep.mubr.msk.f32.mxu1 %vm76_vm0, %v2883_v16 }
  0x2d   :  { %2582 = vmatprep.subr.mxu1 %v2229_v31 }
  0x2e   :  { %2583 = vmatpush3.msra.mxu1 %v2229_v31  ;;  %v2226_v31 = vld [vmem:[%s3448_s4 + $0x58] sm:$0xff] }
  0x2f   :  { %2507 = vmatmul.mubr.msk.f32.gmra.mxu0 %vm76_vm0, %v2883_v16  ;;  %2535 = vmatmul.mubr.msk.f32.gmra.mxu1 %vm76_vm0, %v2896_v17 }
  0x30   :  { %2509 = vmatprep.mubr.msk.f32.mxu0 %vm76_vm0, %v2896_v17  ;;  %2537 = vmatprep.mubr.msk.f32.mxu1 %vm76_vm0, %v2901_v18 }
  0x33   :  { %2510 = vmatmul.mubr.msk.f32.gmra.mxu0 %vm76_vm0, %v2901_v18  ;;  %2538 = vmatmul.mubr.msk.f32.gmra.mxu1 %vm76_vm0, %v2914_v19 }
  0x34   :  { %2512 = vmatprep.mubr.msk.f32.mxu0 %vm76_vm0, %v2914_v19  ;;  %2540 = vmatprep.mubr.msk.f32.mxu1 %vm76_vm0, %v2919_v20 }
  0x37   :  { %2513 = vmatmul.mubr.msk.f32.gmra.mxu0 %vm76_vm0, %v2919_v20  ;;  %2541 = vmatmul.mubr.msk.f32.gmra.mxu1 %vm76_vm0, %v66_v21 }
  0x38   :  { %2515 = vmatprep.mubr.msk.f32.mxu0 %vm76_vm0, %v66_v21  ;;  %2543 = vmatprep.mubr.msk.f32.mxu1 %vm76_vm0, %v67_v22 }
  0x3b   :  { %2516 = vmatmul.mubr.msk.f32.gmra.mxu0 %vm76_vm0, %v67_v22  ;;  %2544 = vmatmul.mubr.msk.f32.gmra.mxu1 %vm76_vm0, %v68_v23 }
  0x3c   :  { %2518 = vmatprep.mubr.msk.f32.mxu0 %vm76_vm0, %v68_v23  ;;  %2546 = vmatprep.mubr.msk.f32.mxu1 %vm76_vm0, %v69_v24 }
  0x3f   :  { %2519 = vmatmul.mubr.msk.f32.gmra.mxu0 %vm76_vm0, %v69_v24  ;;  %2547 = vmatmul.mubr.msk.f32.gmra.mxu1 %vm76_vm0, %v72_v25 }
  0x40   :  { %2521 = vmatprep.mubr.msk.f32.mxu0 %vm76_vm0, %v72_v25  ;;  %2549 = vmatprep.mubr.msk.f32.mxu1 %vm76_vm0, %v433_v27 }
  0x43   :  { %2522 = vmatmul.mubr.msk.f32.gmra.mxu0 %vm76_vm0, %v433_v27  ;;  %2550 = vmatmul.mubr.msk.f32.gmra.mxu1 %vm76_vm0, %v661_v28 }
  0x44   :  { %2556 = vmatprep.mubr.msk.f32.mxu0 %vm76_vm0, %v2850_v10 }
  0x47   :  { %2557 = vmatmul.mubr.msk.f32.vlgmr.msra.gmra.mxu0 %vm76_vm0, %v2860_v12 }
  0x48   :  { %2559 = vmatprep.mubr.msk.f32.mxu0 %vm76_vm0, %v2878_v15 }
  0x4b   :  { %2560 = vmatmul.mubr.msk.f32.gmra.mxu0 %vm76_vm0, %v2883_v16 }
  0x4c   :  { %2562 = vmatprep.mubr.msk.f32.mxu0 %vm76_vm0, %v2896_v17 }
  0x4f   :  { %2563 = vmatmul.mubr.msk.f32.gmra.mxu0 %vm76_vm0, %v2901_v18 }
  0x50   :  { %2565 = vmatprep.mubr.msk.f32.mxu0 %vm76_vm0, %v2914_v19 }
  0x53   :  { %2566 = vmatmul.mubr.msk.f32.gmra.mxu0 %vm76_vm0, %v2919_v20  ;;  %v2228_v20 = vld [vmem:[%s3448_s4 + $0x68] sm:$0xff] }
  0x54   :  { %2568 = vmatprep.mubr.msk.f32.mxu0 %vm76_vm0, %v66_v21  ;;  %v2253_v21 = vld [vmem:[%s3448_s4 + $0xb8] sm:$0xff]  ;;  %2584 = vmatprep.subr.mxu1 %v2228_v20 }
  0x55   :  { %2636 = vmatprep.subr.mxu0 %v2253_v21  ;;  %2585 = vmatpush3.msra.mxu1 %v2228_v20  ;;  %v2250_v20 = vld [vmem:[%s3448_s4 + $0xa0] sm:$0xff] }
  0x56   :  { %2637 = vmatpush3.msra.mxu0 %v2253_v21  ;;  %2586 = vmatprep.subr.mxu1 %v2227_v26 }
  0x57   :  { %2569 = vmatmul.mubr.msk.f32.gmra.mxu0 %vm76_vm0, %v67_v22  ;;  %2587 = vmatpush3.msra.mxu1 %v2227_v26 }
  0x58   :  { %2571 = vmatprep.mubr.msk.f32.mxu0 %vm76_vm0, %v68_v23  ;;  %2588 = vmatprep.subr.mxu1 %v2226_v31 }
  0x59   :  { %2589 = vmatpush3.msra.mxu1 %v2226_v31 }
  0x5b   :  { %2572 = vmatmul.mubr.msk.f32.gmra.mxu0 %vm76_vm0, %v69_v24 }
  0x5c   :  { %2574 = vmatprep.mubr.msk.f32.mxu0 %vm76_vm0, %v72_v25 }
  0x5f   :  { %2575 = vmatmul.mubr.msk.f32.gmra.mxu0 %vm76_vm0, %v433_v27  ;;  %v2252_v27 = vld [vmem:[%s3448_s4 + $0xb0] sm:$0xff] }
  0x60   :  { %2577 = vmatprep.mubr.msk.f32.mxu0 %vm76_vm0, %v661_v28  ;;  %2638 = vmatprep.subr.mxu0 %v2252_v27 }
  0x61   :  { %2639 = vmatpush3.msra.mxu0 %v2252_v27 }
  0x63   :  { %2578 = vmatmul.mubr.msk.f32.gmra.mxu0 %vm76_vm0, %v889_v29 }
  0xc7   :  { %v2446_v32 = vpop.f32.mrf.mxu0  ;;  %v2474_v33 = vpop.f32.mrf.mxu1 }
  0xc8   :  { %v345_v24 = vadd.f32 %v2474_v33, %v2446_v32  ;;  %v2251_v32 = vld [vmem:[%s3448_s4 + $0xa8] sm:$0xff] }
  0xc9   :  { %v191_v34 = vpop.f32.mrf.mxu0  ;;  %v339_v35 = vpop.f32.mrf.mxu1  ;;  %2640 = vmatprep.subr.mxu0 %v2251_v32 }
  0xca   :  { %v340_v25 = vadd.f32 %v339_v35, %v191_v34  ;;  %2641 = vmatpush3.msra.mxu0 %v2251_v32 }
  0xcb   :  { %v3046_v36 = vpop.f32.mrf.mxu0  ;;  %v3048_v37 = vpop.f32.mrf.mxu1  ;;  %2642 = vmatprep.subr.mxu0 %v2250_v20 }
  0xcc   :  { %v355_v33 = vadd.f32 %v3048_v37, %v3046_v36  ;;  %2643 = vmatpush3.msra.mxu0 %v2250_v20 }
  0xcd   :  { %v3050_v38 = vpop.f32.mrf.mxu0  ;;  %v3052_v39 = vpop.f32.mrf.mxu1 }
  0xcf   :  { %v3054_v40 = vpop.f32.mrf.mxu0  ;;  %v3056_v41 = vpop.f32.mrf.mxu1 }
  0xd0   :  { %v365_v26 = vadd.f32 %v3056_v41, %v3054_v40  ;;  %v2248_v40 = vld [vmem:[%s3448_s4 + $0x90] sm:$0xff] }
  0xd1   :  { %v3058_v42 = vpop.f32.mrf.mxu0  ;;  %v3060_v43 = vpop.f32.mrf.mxu1 }
  0xd3   :  { %v3062_v44 = vpop.f32.mrf.mxu0  ;;  %v3064_v45 = vpop.f32.mrf.mxu1 }
  0xd5   :  { %v3066_v46 = vpop.f32.mrf.mxu0  ;;  %v3068_v47 = vpop.f32.mrf.mxu1 }
  0xd7   :  { %v3070_v48 = vpop.f32.mrf.mxu0  ;;  %v3072_v49 = vpop.f32.mrf.mxu1 }
  0xd9   :  { %v3074_v50 = vpop.f32.mrf.mxu0  ;;  %v3076_v51 = vpop.f32.mrf.mxu1 }
  0xdb   :  { %v3078_v52 = vpop.f32.mrf.mxu0  ;;  %v3080_v53 = vpop.f32.mrf.mxu1 }
  0xdd   :  { %v3082_v54 = vpop.f32.mrf.mxu0  ;;  %v3084_v55 = vpop.f32.mrf.mxu1 }
  0xdf   :  { %v3086_v56 = vpop.f32.mrf.mxu0  ;;  %v3088_v57 = vpop.f32.mrf.mxu1 }
  0xe1   :  { %v3090_v58 = vpop.f32.mrf.mxu0  ;;  %v3092_v59 = vpop.f32.mrf.mxu1 }
  0xe3   :  { %v3094_v60 = vpop.f32.mrf.mxu0  ;;  %v3096_v61 = vpop.f32.mrf.mxu1 }
  0xe5   :  { %v3098_v62 = vpop.f32.mrf.mxu0  ;;  %v3100_v63 = vpop.f32.mrf.mxu1 }
  0xe7   :  { %v2502_v0 = vpop.f32.mrf.mxu0  ;;  %v2530_v1 = vpop.f32.mrf.mxu1 }
  0xe8   :  { %v631_v29 = vadd.f32 %v2502_v0, %v345_v24  ;;  %v350_v0 = vadd.f32 %v3052_v39, %v3050_v38  ;;  %v2224_v38 = vld [vmem:[%s3448_s4 + $0x48] sm:$0xff]  ;;  %v2249_v39 = vld [vmem:[%s3448_s4 + $0x98] sm:$0xff] }
  0xe9   :  { %v551_v2 = vpop.f32.mrf.mxu0  ;;  %v779_v3 = vpop.f32.mrf.mxu1  ;;  %2644 = vmatprep.subr.mxu0 %v2249_v39 }
  0xea   :  { %v630_v30 = vadd.f32 %v551_v2, %v340_v25  ;;  %v2225_v2 = vld [vmem:[%s3448_s4 + $0x50] sm:$0xff]  ;;  %v859_v21 = vadd.f32 %v2530_v1, %v631_v29  ;;  %v360_v1 = vadd.f32 %v3060_v43, %v3058_v42  ;;  %2645 = vmatpush3.msra.mxu0 %v2249_v39  ;;  %v2223_v29 = vld [vmem:[%s3448_s4 + $0x40] sm:$0xff] }
  0xeb   :  { %v2505_v4 = vpop.f32.mrf.mxu0  ;;  %v3102_v6 = vpop.f32.mrf.mxu1  ;;  %2590 = vmatprep.subr.mxu1 %v2225_v2  ;;  %2646 = vmatprep.subr.mxu0 %v2248_v40 }
  0xec   :  { %v633_v36 = vadd.f32 %v2505_v4, %v355_v33  ;;  %v858_v24 = vadd.f32 %v779_v3, %v630_v30  ;;  %2591 = vmatpush3.msra.mxu1 %v2225_v2  ;;  %2647 = vmatpush3.msra.mxu0 %v2248_v40  ;;  %v2247_v33 = vld [vmem:[%s3448_s4 + $0x88] sm:$0xff]  ;;  %v370_v2 = vadd.f32 %v3068_v47, %v3066_v46 }
  0xed   :  { %v561_v5 = vpop.f32.mrf.mxu0  ;;  %v3106_v8 = vpop.f32.mrf.mxu1  ;;  %2592 = vmatprep.subr.mxu1 %v2224_v38  ;;  %2648 = vmatprep.subr.mxu0 %v2247_v33 }
  0xee   :  { %v632_v25 = vadd.f32 %v561_v5, %v350_v0  ;;  %2593 = vmatpush3.msra.mxu1 %v2224_v38  ;;  %v861_v41 = vadd.f32 %v3102_v6, %v633_v36  ;;  %v375_v6 = vadd.f32 %v3064_v45, %v3062_v44  ;;  %2649 = vmatpush3.msra.mxu0 %v2247_v33 }
  0xef   :  { %v3104_v7 = vpop.f32.mrf.mxu0  ;;  %v3112_v11 = vpop.f32.mrf.mxu1  ;;  %2594 = vmatprep.subr.mxu1 %v2223_v29  ;;  %v380_v38 = vadd.f32 %v3076_v51, %v3074_v50  ;;  %v395_v50 = vadd.f32 %v3080_v53, %v3078_v52  ;;  %v390_v51 = vadd.f32 %v3084_v55, %v3082_v54  ;;  %v3237_v52 = vld [vmem:[%s3448_s4 + $0x38] sm:$0xff]  ;;  %v405_v53 = vadd.f32 %v3088_v57, %v3086_v56 }
  0xf0   :  { %v635_v30 = vadd.f32 %v3104_v7, %v365_v26  ;;  %v860_v42 = vadd.f32 %v3106_v8, %v632_v25  ;;  %2595 = vmatpush3.msra.mxu1 %v2223_v29  ;;  %v415_v33 = vadd.f32 %v3096_v61, %v3094_v60 }
  0xf1   :  { %v3108_v9 = vpop.f32.mrf.mxu0  ;;  %v3118_v14 = vpop.f32.mrf.mxu1  ;;  %2608 = vmatprep.subr.mxu1 %v3237_v52 }
  0xf2   :  { %v634_v43 = vadd.f32 %v3108_v9, %v360_v1  ;;  %v2246_v9 = vld [vmem:[%s3448_s4 + $0x80] sm:$0xff]  ;;  %v863_v36 = vadd.f32 %v3112_v11, %v635_v30 }
  0xf3   :  { %v3110_v10 = vpop.f32.mrf.mxu0  ;;  %v3124_v17 = vpop.f32.mrf.mxu1  ;;  %2650 = vmatprep.subr.mxu0 %v2246_v9 }
  0xf4   :  { %v637_v45 = vadd.f32 %v3110_v10, %v375_v6  ;;  %2651 = vmatpush3.msra.mxu0 %v2246_v9 }
  0xf5   :  { %v3114_v12 = vpop.f32.mrf.mxu0  ;;  %v3136_v22 = vpop.f32.mrf.mxu1 }
  0xf6   :  { %v636_v46 = vadd.f32 %v3114_v12, %v370_v2  ;;  %v865_v12 = vadd.f32 %v3124_v17, %v637_v45 }
  0xf7   :  { %v3116_v13 = vpop.f32.mrf.mxu0  ;;  %v3156_v34 = vpop.f32.mrf.mxu1 }
  0xf8   :  { %v864_v26 = vadd.f32 %v3136_v22, %v636_v46 }
  0xf9   :  { %v3120_v15 = vpop.f32.mrf.mxu0  ;;  %v3176_v4 = vpop.f32.mrf.mxu1 }
  0xfb   :  { %v3122_v16 = vpop.f32.mrf.mxu0  ;;  %v2545_v0 = vpop.f32.mrf.mxu1 }
  0xfd   :  { %v3126_v18 = vpop.f32.mrf.mxu0 }
  0xfe   :  { %v640_v29 = vadd.f32 %v3126_v18, %v390_v51 }
  0xff   :  { %v3128_v19 = vpop.f32.mrf.mxu0 }
 0x100   :  { %v643_v18 = vadd.f32 %v3128_v19, %v405_v53 }
 0x101   :  { %v3138_v23 = vpop.f32.mrf.mxu0 }
 0x103   :  { %v3146_v28 = vpop.f32.mrf.mxu0 }
 0x105   :  { %v3158_v35 = vpop.f32.mrf.mxu0 }
 0x107   :  { %v2558_v37 = vpop.f32.mrf.mxu0 }
 0x108   :  { %v1087_v3 = vadd.f32 %v2558_v37, %v859_v21  ;;  %v862_v37 = vadd.f32 %v3118_v14, %v634_v43  ;;  %v385_v21 = vadd.f32 %v3072_v49, %v3070_v48 }
 0x109   :  { %v1007_v27 = vpop.f32.mrf.mxu0 }
 0x10a   :  { %v1086_v5 = vadd.f32 %v1007_v27, %v858_v24  ;;  %v829_v24 = vpop.f32.mrf.mxu1  ;;  %v639_v10 = vadd.f32 %v3116_v13, %v385_v21  ;;  %v638_v27 = vadd.f32 %v3120_v15, %v380_v38  ;;  %v641_v15 = vadd.f32 %v3122_v16, %v395_v50  ;;  %v3274_v21 = vld [vmem:[%s3449_s3] ss:$0 sm:$0xff] }
 0x10b   :  { %v2561_v31 = vpop.f32.mrf.mxu0  ;;  %v400_v16 = vadd.f32 %v3092_v59, %v3090_v58  ;;  %v410_v58 = vadd.f32 %v3100_v63, %v3098_v62 }
 0x10c   :  { %v3190_v32 = vmax.f32 %v1086_v5, %v1087_v3  ;;  %v1089_v8 = vadd.f32 %v2561_v31, %v861_v41  ;;  %v2548_v49 = vpop.f32.mrf.mxu1  ;;  %v867_v13 = vadd.f32 %v3156_v34, %v639_v10  ;;  %v866_v22 = vadd.f32 %v3176_v4, %v638_v27 }
 0x10d   :  { %v1017_v7 = vpop.f32.mrf.mxu0  ;;  %v869_v30 = vadd.f32 %v2545_v0, %v641_v15  ;;  %v868_v31 = vadd.f32 %v829_v24, %v640_v29  ;;  %v871_v19 = vadd.f32 %v2548_v49, %v643_v18  ;;  %v644_v2 = vadd.f32 %v3158_v35, %v410_v58  ;;  %v1185_v29 = vld [vmem:[%s3448_s4 + $0x20] sm:$0xff]  ;;  %v1183_v18 = vld [vmem:[%s3448_s4 + $0x10] sm:$0xff] }
 0x10e   :  { %v1088_v20 = vadd.f32 %v1017_v7, %v860_v42  ;;  %1104 = vrot.lane.b32.xlu0 %v3190_v32, %s2724_s28  ;;  %v839_v54 = vpop.f32.mrf.mxu1  ;;  %v642_v42 = vadd.f32 %v3138_v23, %v400_v16  ;;  %v645_v7 = vadd.f32 %v3146_v28, %v415_v33  ;;  %v2725_v35 = vmov 0.0   ;;  %v1181_v33 = vld [vmem:[%s3448_s4] sm:$0xff] }
 0x10f   :  { %v2564_v44 = vpop.f32.mrf.mxu0  ;;  %2692 = vmatprep.subr.mxu0 %v2725_v35 }
 0x110   :  { %v3208_v47 = vmax.f32 %v1088_v20, %v1089_v8  ;;  %v1091_v11 = vadd.f32 %v2564_v44, %v863_v36  ;;  %v2551_v57 = vpop.f32.mrf.mxu1  ;;  %v870_v23 = vadd.f32 %v839_v54, %v642_v42  ;;  %v1184_v54 = vld [vmem:[%s3448_s4 + $0x18] sm:$0xff]  ;;  %v1182_v42 = vld [vmem:[%s3448_s4 + $0x8] sm:$0xff] }
 0x111   :  { %v1027_v25 = vpop.f32.mrf.mxu0  ;;  %v873_v63 = vadd.f32 %v2551_v57, %v645_v7 }
 0x112   :  { %v1090_v39 = vadd.f32 %v1027_v25, %v862_v37  ;;  %1120 = vrot.lane.b32.xlu0 %v3208_v47, %s2724_s28  ;;  %v849_v20 = vpop.f32.mrf.mxu1 }
 0x113   :  { %v2567_v14 = vpop.f32.mrf.mxu0  ;;  %v872_v36 = vadd.f32 %v849_v20, %v644_v2 }
 0x114   :  { %v3220_v48 = vmax.f32 %v1090_v39, %v1091_v11  ;;  %v1093_v3 = vadd.f32 %v2567_v14, %v865_v12 }
 0x115   :  { %v1037_v1 = vpop.f32.mrf.mxu0 }
 0x116   :  { %v1092_v5 = vadd.f32 %v1037_v1, %v864_v26  ;;  %1129 = vrot.lane.b32.xlu1 %v3220_v48, %s2724_s28 }
 0x117   :  { %v2570_v17 = vpop.f32.mrf.mxu0 }
 0x118   :  { %v3232_v40 = vmax.f32 %v1092_v5, %v1093_v3  ;;  %v1095_v34 = vadd.f32 %v2570_v17, %v867_v13  ;;  %v1186_v13 = vld [vmem:[%s3448_s4 + $0x28] sm:$0xff] }
 0x119   :  { %v1047_v55 = vpop.f32.mrf.mxu0 }
 0x11a   :  { %v1094_v4 = vadd.f32 %v1047_v55, %v866_v22  ;;  %1138 = vrot.lane.b32.xlu1 %v3232_v40, %s2724_s28 }
 0x11b   :  { %v2573_v41 = vpop.f32.mrf.mxu0 }
 0x11c   :  { %v3248_v56 = vmax.f32 %v1094_v4, %v1095_v34  ;;  %v1097_v59 = vadd.f32 %v2573_v41, %v869_v30 }
 0x11d   :  { %v1057_v43 = vpop.f32.mrf.mxu0 }
 0x11e   :  { %v1096_v6 = vadd.f32 %v1057_v43, %v868_v31  ;;  %1147 = vrot.lane.b32.xlu0 %v3248_v56, %s2724_s28 }
 0x11f   :  { %v2576_v0 = vpop.f32.mrf.mxu0 }
 0x120   :  { %v3258_v8 = vmax.f32 %v1096_v6, %v1097_v59  ;;  %v1099_v60 = vadd.f32 %v2576_v0, %v871_v19 }
 0x121   :  { %v1067_v9 = vpop.f32.mrf.mxu0 }
 0x122   :  { %v1098_v61 = vadd.f32 %v1067_v9, %v870_v23  ;;  %1156 = vrot.lane.b32.xlu1 %v3258_v8, %s2724_s28  ;;  %v2263_v23 = vld [vmem:[%s3450_s6 + $0x18] sm:$0xff] }
 0x123   :  { %v2579_v62 = vpop.f32.mrf.mxu0 }
 0x124   :  { %v3262_v44 = vmax.f32 %v1098_v61, %v1099_v60  ;;  %v1101_v37 = vadd.f32 %v2579_v62, %v873_v63 }
 0x125   :  { %v1077_v45 = vpop.f32.mrf.mxu0 }
 0x126   :  { %v1100_v28 = vadd.f32 %v1077_v45, %v872_v36  ;;  %1165 = vrot.lane.b32.xlu0 %v3262_v44, %s2724_s28 }
 0x128   :  { %v3267_v46 = vmax.f32 %v1100_v28, %v1101_v37 }
 0x12a   :  { %1174 = vrot.lane.b32.xlu1 %v3267_v46, %s2724_s28 }
 0x180   :  { %v1105_v24 = vpop.permute.xlu0 %1104 }
 0x181   :  { %v1107_v25 = vmax.f32 %v3190_v32, %v1105_v24 }
 0x183   :  { %v1115_v38 = vadd.f32 %v3274_v21, %v1107_v25 }
 0x184   :  { %v1121_v11 = vpop.permute.xlu0 %1120 }
 0x185   :  { %v1116_v39 = vmul.f32 0.01, %v1115_v38  ;;  %v1123_v10 = vmax.f32 %v3208_v47, %v1121_v11  ;;  %v1187_v47 = vld [vmem:[%s3448_s4 + $0x30] sm:$0xff] }
 0x187   :  { %v3279_v14 = vmax.f32 %v1115_v38, %v1116_v39  ;;  %v1124_v12 = vadd.f32 %v3274_v21, %v1123_v10 }
 0x188   :  { %v1130_v26 = vpop.permute.xlu1 %1129 }
 0x189   :  { %v1125_v27 = vmul.f32 0.01, %v1124_v12  ;;  %v1132_v49 = vmax.f32 %v3220_v48, %v1130_v26  ;;  %2596 = vmatprep.mubr.msk.f32.mxu1 %vm1198_vm1, %v3279_v14 }
 0x18b   :  { %v3285_v1 = vmax.f32 %v1124_v12, %v1125_v27  ;;  %v1133_v32 = vadd.f32 %v3274_v21, %v1132_v49  ;;  %v2262_v12 = vld [vmem:[%s3450_s6 + $0x10] sm:$0xff] }
 0x18c   :  { %v1139_v50 = vpop.permute.xlu1 %1138 }
 0x18d   :  { %v1134_v51 = vmul.f32 0.01, %v1133_v32  ;;  %v1141_v3 = vmax.f32 %v3232_v40, %v1139_v50  ;;  %2597 = vmatmul.mubr.msk.f32.vlgmr.msra.gmra.mxu1 %vm1198_vm1, %v3285_v1  ;;  %2652 = vmatprep.mubr.msk.f32.mxu0 %vm1198_vm1, %v3285_v1 }
 0x18e   :  { %2609 = vmatpush3.msra.mxu1 %v3237_v52 }
 0x18f   :  { %v1135_v48 = vmax.f32 %v1133_v32, %v1134_v51  ;;  %v1142_v5 = vadd.f32 %v3274_v21, %v1141_v3  ;;  %2610 = vmatprep.subr.mxu1 %v1187_v47 }
 0x190   :  { %v1148_v17 = vpop.permute.xlu0 %1147  ;;  %2611 = vmatpush3.msra.mxu1 %v1187_v47 }
 0x191   :  { %v1143_v15 = vmul.f32 0.01, %v1142_v5  ;;  %v1150_v22 = vmax.f32 %v3248_v56, %v1148_v17  ;;  %2599 = vmatprep.mubr.msk.f32.mxu1 %vm1198_vm1, %v1135_v48  ;;  %2653 = vmatmul.mubr.msk.f32.vlgmr.msra.gmra.mxu0 %vm1198_vm1, %v1135_v48 }
 0x192   :  { %2612 = vmatprep.subr.mxu1 %v1186_v13 }
 0x193   :  { %v1144_v40 = vmax.f32 %v1142_v5, %v1143_v15  ;;  %v1151_v52 = vadd.f32 %v3274_v21, %v1150_v22  ;;  %2613 = vmatpush3.msra.mxu1 %v1186_v13 }
 0x194   :  { %v1157_v53 = vpop.permute.xlu1 %1156  ;;  %2614 = vmatprep.subr.mxu1 %v1185_v29 }
 0x195   :  { %v1152_v55 = vmul.f32 0.01, %v1151_v52  ;;  %v1159_v16 = vmax.f32 %v3258_v8, %v1157_v53  ;;  %2600 = vmatmul.mubr.msk.f32.gmra.mxu1 %vm1198_vm1, %v1144_v40  ;;  %2655 = vmatprep.mubr.msk.f32.mxu0 %vm1198_vm1, %v1144_v40 }
 0x196   :  { %2615 = vmatpush3.msra.mxu1 %v1185_v29 }
 0x197   :  { %v1153_v34 = vmax.f32 %v1151_v52, %v1152_v55  ;;  %v1160_v4 = vadd.f32 %v3274_v21, %v1159_v16  ;;  %2616 = vmatprep.subr.mxu1 %v1184_v54 }
 0x198   :  { %v1166_v41 = vpop.permute.xlu0 %1165  ;;  %2617 = vmatpush3.msra.mxu1 %v1184_v54 }
 0x199   :  { %v1161_v30 = vmul.f32 0.01, %v1160_v4  ;;  %v1168_v31 = vmax.f32 %v3262_v44, %v1166_v41  ;;  %2602 = vmatprep.mubr.msk.f32.mxu1 %vm1198_vm1, %v1153_v34  ;;  %2656 = vmatmul.mubr.msk.f32.gmra.mxu0 %vm1198_vm1, %v1153_v34 }
 0x19a   :  { %2618 = vmatprep.subr.mxu1 %v1183_v18 }
 0x19b   :  { %v1162_v56 = vmax.f32 %v1160_v4, %v1161_v30  ;;  %v1169_v57 = vadd.f32 %v3274_v21, %v1168_v31  ;;  %2619 = vmatpush3.msra.mxu1 %v1183_v18  ;;  %v2261_v18 = vld [vmem:[%s3451_s5] ss:$0 sm:$0xff] }
 0x19c   :  { %v1175_v43 = vpop.permute.xlu1 %1174  ;;  %2620 = vmatprep.subr.mxu1 %v1182_v42 }
 0x19d   :  { %v1170_v58 = vmul.f32 0.01, %v1169_v57  ;;  %v1177_v59 = vmax.f32 %v3267_v46, %v1175_v43  ;;  %2603 = vmatmul.mubr.msk.f32.gmra.mxu1 %vm1198_vm1, %v1162_v56  ;;  %2658 = vmatprep.mubr.msk.f32.mxu0 %vm1198_vm1, %v1162_v56 }
 0x19e   :  { %2621 = vmatpush3.msra.mxu1 %v1182_v42 }
 0x19f   :  { %v1171_v6 = vmax.f32 %v1169_v57, %v1170_v58  ;;  %v1178_v19 = vadd.f32 %v3274_v21, %v1177_v59  ;;  %2622 = vmatprep.subr.mxu1 %v1181_v33 }
 0x1a0   :  { %2623 = vmatpush3.msra.mxu1 %v1181_v33 }
 0x1a1   :  { %v1179_v0 = vmul.f32 0.01, %v1178_v19  ;;  %2605 = vmatprep.mubr.msk.f32.mxu1 %vm1198_vm1, %v1171_v6  ;;  %2659 = vmatmul.mubr.msk.f32.gmra.mxu0 %vm1198_vm1, %v1171_v6 }
 0x1a2   :  { %2664 = vmatprep.subr.mxu1 %v2725_v35 }
 0x1a3   :  { %v1180_v7 = vmax.f32 %v1178_v19, %v1179_v0 }
 0x1a5   :  { %2606 = vmatmul.mubr.msk.f32.gmra.mxu1 %vm1198_vm1, %v1180_v7  ;;  %2661 = vmatprep.mubr.msk.f32.mxu0 %vm1198_vm1, %v1180_v7  ;;  %v1574_v7 = vld [vmem:[%s3450_s6] sm:$0xff] }
 0x1a6   :  { %2624 = vmatprep.mubr.f32.mxu1 %v2725_v35  ;;  %2662 = vmatmul.mubr.f32.gmra.mxu0 %v2725_v35 }
 0x1a7   :  { %2700 = vmatprep.mubr.msk.f32.mxu0 %vm2726_vm2, %v2725_v35 }
 0x1a9   :  { %2625 = vmatmul.mubr.msk.f32.vlgmr.msra.gmra.mxu1 %vm1198_vm1, %v3279_v14 }
 0x1aa   :  { %2627 = vmatprep.mubr.msk.f32.mxu1 %vm1198_vm1, %v3285_v1  ;;  %2665 = vmatpush3.msra.mxu1 %v2263_v23 }
 0x1ab   :  { %2666 = vmatprep.subr.mxu1 %v2725_v35 }
 0x1ac   :  { %2667 = vmatpush3.msra.mxu1 %v2262_v12  ;;  %v2272_v12 = vld [vmem:[%s3453_s7] ss:$0 sm:$0xff] }
 0x1ad   :  { %2628 = vmatmul.mubr.msk.f32.gmra.mxu1 %vm1198_vm1, %v1135_v48  ;;  %2671 = vmatprep.subr.mxu1 %v2725_v35 }
 0x1ae   :  { %2630 = vmatprep.mubr.msk.f32.mxu1 %vm1198_vm1, %v1144_v40 }
 0x1b1   :  { %2631 = vmatmul.mubr.msk.f32.gmra.mxu1 %vm1198_vm1, %v1153_v34 }
 0x1b2   :  { %2633 = vmatprep.mubr.msk.f32.mxu1 %vm1198_vm1, %v1162_v56 }
 0x1b5   :  { %2634 = vmatmul.mubr.msk.f32.gmra.mxu1 %vm1198_vm1, %v1171_v6  ;;  %v1575_v6 = vld [vmem:[%s3450_s6 + $0x8] sm:$0xff] }
 0x1b6   :  { %2668 = vmatprep.mubr.msk.f32.mxu1 %vm2726_vm2, %v2725_v35 }
 0x24d   :  { %v2598_v2 = vpop.f32.mrf.mxu1 }
 0x24f   :  { %v1289_v8 = vpop.f32.mrf.mxu1 }
 0x251   :  { %v2654_v61 = vpop.f32.mrf.mxu0 }
 0x253   :  { %v1511_v63 = vpop.f32.mrf.mxu0 }
 0x255   :  { %v2601_v20 = vpop.f32.mrf.mxu1 }
 0x257   :  { %v1299_v9 = vpop.f32.mrf.mxu1 }
 0x259   :  { %v2657_v44 = vpop.f32.mrf.mxu0 }
 0x25b   :  { %v1521_v46 = vpop.f32.mrf.mxu0 }
 0x25d   :  { %v2604_v60 = vpop.f32.mrf.mxu1 }
 0x25f   :  { %v1309_v62 = vpop.f32.mrf.mxu1 }
 0x261   :  { %v2660_v25 = vpop.f32.mrf.mxu0 }
 0x263   :  { %v1531_v49 = vpop.f32.mrf.mxu0 }
 0x265   :  { %v2607_v36 = vpop.f32.mrf.mxu1 }
 0x266   :  { %v2663_v3 = vpop.f32.mrf.mxu0 }
 0x267   :  { %v1319_v45 = vpop.f32.mrf.mxu1 }
 0x268   :  { %v1541_v40 = vpop.f32.mrf.mxu0 }
 0x269   :  { %v2626_v37 = vpop.f32.mrf.mxu1 }
 0x26a   :  { %v1403_v28 = vadd.f32 %v2626_v37, %v2598_v2  ;;  %v1917_v37 = vld [vmem:[%s3452_s8 + $0x8] sm:$0xff] }
 0x26b   :  { %v1397_v21 = vpop.f32.mrf.mxu1 }
 0x26c   :  { %v1398_v24 = vadd.f32 %v1397_v21, %v1289_v8  ;;  %v1551_v11 = vadd.f32 %v2654_v61, %v1403_v28  ;;  %v1916_v28 = vld [vmem:[%s3452_s8] sm:$0xff] }
 0x26d   :  { %v2629_v38 = vpop.f32.mrf.mxu1 }
 0x26e   :  { %v1550_v39 = vadd.f32 %v1511_v63, %v1398_v24  ;;  %v1413_v10 = vadd.f32 %v2629_v38, %v2601_v20  ;;  %v2267_v20 = vld [vmem:[%s3450_s6 + $0x28] sm:$0xff]  ;;  %v2269_v63 = vld [vmem:[%s3450_s6 + $0x30] sm:$0xff] }
 0x26f   :  { %v1407_v14 = vpop.f32.mrf.mxu1 }
 0x270   :  { %v1408_v26 = vadd.f32 %v1407_v14, %v1299_v9  ;;  %v1558_v27 = vmax.f32 %v1550_v39, %v1551_v11  ;;  %v1553_v32 = vadd.f32 %v2657_v44, %v1413_v10  ;;  %v2266_v9 = vld [vmem:[%s3450_s6 + $0x20] sm:$0xff]  ;;  %v1919_v44 = vld [vmem:[%s3452_s8 + $0x18] sm:$0xff] }
 0x271   :  { %v2632_v1 = vpop.f32.mrf.mxu1  ;;  %2693 = vmatpush3.msra.mxu0 %v1919_v44 }
 0x272   :  { %v1552_v50 = vadd.f32 %v1521_v46, %v1408_v26  ;;  %v1423_v47 = vadd.f32 %v2632_v1, %v2604_v60  ;;  %1560 = vrot.lane.b32.xlu1 %v1558_v27, %s2727_s19  ;;  %2694 = vmatprep.subr.mxu0 %v2725_v35 }
 0x273   :  { %v1417_v51 = vpop.f32.mrf.mxu1 }
 0x274   :  { %v1418_v48 = vadd.f32 %v1417_v51, %v1309_v62  ;;  %v1576_v5 = vmax.f32 %v1552_v50, %v1553_v32  ;;  %v1555_v17 = vadd.f32 %v2660_v25, %v1423_v47  ;;  %v2270_v62 = vld [vmem:[%s3450_s6 + $0x38] sm:$0xff]  ;;  %v2027_v50 = vld [vmem:[%s3454_s12 + $0x8] sm:$0xff]  ;;  %v2026_v47 = vld [vmem:[%s3454_s12] sm:$0xff]  ;;  %v2728_v51 = vmov 0  }
 0x275   :  { %v2635_v13 = vpop.f32.mrf.mxu1  ;;  %2715 = vset.pattern.permute.xlu0 %v2728_v51 }
 0x276   :  { %v1554_v15 = vadd.f32 %v1531_v49, %v1418_v48  ;;  %v1433_v22 = vadd.f32 %v2635_v13, %v2607_v36  ;;  %1578 = vrot.lane.b32.xlu0 %v1576_v5, %s2727_s19  ;;  %v22_v48 = vstv %s3456_s11 }
 0x277   :  { %v1427_v29 = vpop.f32.mrf.mxu1  ;;  %23 = vst [vmem:[#allocation3] sm:$0x1] %v22_v48 }
 0x278   :  { %v1428_v52 = vadd.f32 %v1427_v29, %v1319_v45  ;;  %v1734_v53 = vmax.f32 %v1554_v15, %v1555_v17  ;;  %v1557_v54 = vadd.f32 %v2663_v3, %v1433_v22  ;;  %v1918_v45 = vld [vmem:[%s3452_s8 + $0x10] sm:$0xff]  ;;  %v20_v3 = vstv %s3455_s10 }
 0x279   :  { %2695 = vmatpush3.msra.mxu0 %v1918_v45  ;;  %21 = vst [vmem:[#allocation2] sm:$0x1] %v20_v3 }
 0x27a   :  { %v1556_v55 = vadd.f32 %v1541_v40, %v1428_v52  ;;  %1736 = vrot.lane.b32.xlu0 %v1734_v53, %s2727_s19  ;;  %2696 = vmatprep.subr.mxu0 %v2725_v35 }
 0x27b   :  { %2697 = vmatpush3.msra.mxu0 %v1917_v37 }
 0x27c   :  { %v1820_v16 = vmax.f32 %v1556_v55, %v1557_v54  ;;  %2698 = vmatprep.subr.mxu0 %v2725_v35 }
 0x27d   :  { %2699 = vmatpush3.msra.mxu0 %v1916_v28 }
 0x27e   :  { %1822 = vrot.lane.b32.xlu1 %v1820_v16, %s2727_s19  ;;  %v2276_v13 = vld [vmem:[#allocation3] ss:$0 sm:$0xff] }
 0x2e4   :  { %v1561_v34 = vpop.permute.xlu1 %1560 }
 0x2e5   :  { %v1563_v4 = vmax.f32 %v1558_v27, %v1561_v34 }
 0x2e7   :  { %v1571_v31 = vadd.f32 %v2261_v18, %v1563_v4 }
 0x2e8   :  { %v1579_v41 = vpop.permute.xlu0 %1578 }
 0x2e9   :  { %v1581_v30 = vmax.f32 %v1576_v5, %v1579_v41  ;;  %v1572_v33 = vmul.f32 0.01, %v1571_v31  ;;  %v2275_v5 = vld [vmem:[#allocation2] ss:$0 sm:$0xff] }
 0x2eb   :  { %v1582_v42 = vadd.f32 %v2261_v18, %v1581_v30  ;;  %v1573_v23 = vmax.f32 %v1571_v31, %v1572_v33 }
 0x2ec   :  { %v1737_v56 = vpop.permute.xlu0 %1736 }
 0x2ed   :  { %v1583_v57 = vmul.f32 0.01, %v1582_v42  ;;  %v1739_v43 = vmax.f32 %v1734_v53, %v1737_v56  ;;  %v2273_v53 = vld [vmem:[%s3458_s9] ss:$0 sm:$0xff] }
 0x2ef   :  { %v1584_v58 = vmax.f32 %v1582_v42, %v1583_v57  ;;  %v1740_v59 = vadd.f32 %v2261_v18, %v1739_v43  ;;  %v2280_v42 = vld [vmem:[%s3460_s14] ss:$0 sm:$0xff] }
 0x2f0   :  { %v1823_v19 = vpop.permute.xlu1 %1822 }
 0x2f1   :  { %v1825_v0 = vmax.f32 %v1820_v16, %v1823_v19  ;;  %2669 = vmatmul.mubr.msk.f32.vlgmr.msra.gmra.mxu1 %vm76_vm0, %v1584_v58  ;;  %v1741_v2 = vmul.f32 0.01, %v1740_v59 }
 0x2f2   :  { %2672 = vmatpush3.msra.mxu1 %v1575_v6  ;;  %2675 = vmatprep.mubr.msk.f32.mxu1 %vm2726_vm2, %v2725_v35 }
 0x2f3   :  { %v1826_v8 = vadd.f32 %v2261_v18, %v1825_v0  ;;  %2673 = vmatprep.subr.mxu1 %v2725_v35  ;;  %v1742_v60 = vmax.f32 %v1740_v59, %v1741_v2  ;;  %v2278_v18 = vld [vmem:[%s3459_s13] ss:$0 sm:$0xff] }
 0x2f4   :  { %2674 = vmatpush3.msra.mxu1 %v1574_v7 }
 0x2f5   :  { %2676 = vmatmul.mubr.msk.f32.vlgmr.msra.gmra.mxu1 %vm76_vm0, %v1573_v23  ;;  %2678 = vmatprep.subr.mxu1 %v2725_v35  ;;  %v1827_v61 = vmul.f32 0.01, %v1826_v8 }
 0x2f6   :  { %2679 = vmatpush3.msra.mxu1 %v2267_v20  ;;  %2682 = vmatprep.mubr.msk.f32.mxu1 %vm2726_vm2, %v2725_v35 }
 0x2f7   :  { %2680 = vmatprep.subr.mxu1 %v2725_v35  ;;  %v1828_v36 = vmax.f32 %v1826_v8, %v1827_v61 }
 0x2f8   :  { %2681 = vmatpush3.msra.mxu1 %v2266_v9 }
 0x2f9   :  { %2683 = vmatmul.mubr.msk.f32.vlgmr.msra.gmra.mxu1 %vm76_vm0, %v1742_v60  ;;  %2685 = vmatprep.subr.mxu1 %v2725_v35 }
 0x2fa   :  { %2686 = vmatpush3.msra.mxu1 %v2270_v62  ;;  %2689 = vmatprep.mubr.msk.f32.mxu1 %vm2726_vm2, %v2725_v35 }
 0x2fb   :  { %2687 = vmatprep.subr.mxu1 %v2725_v35 }
 0x2fc   :  { %2688 = vmatpush3.msra.mxu1 %v2269_v63 }
 0x2fd   :  { %2690 = vmatmul.mubr.msk.f32.vlgmr.msra.gmra.mxu1 %vm76_vm0, %v1828_v36  ;;  %2703 = vmatprep.subr.mxu1 %v2725_v35 }
 0x2fe   :  { %2707 = vmatprep.mubr.msk.f32.mxu1 %vm2726_vm2, %v2725_v35  ;;  %2704 = vmatpush3.msra.mxu1 %v2027_v50 }
 0x2ff   :  { %2705 = vmatprep.subr.mxu1 %v2725_v35  ;;  %v2003_v35 = vld [vmem:[%s3457_s1] sm:$0xff] }
 0x300   :  { %2706 = vmatpush3.msra.mxu1 %v2026_v47  ;;  %v2011_v17 = vmul.f32 %v2275_v5, %v2003_v35 }
 0x302   :  { %v2019_v15 = vadd.f32 %v2276_v13, %v2011_v17 }
 0x304   :  { %v2277_v22 = vmul.f32 -1.442695, %v2019_v15 }
 0x306   :  { %2716 = vpow2.f32 %v2277_v22 }
 0x313   :  { %v2717_v29 = vpop.eup %2716 }
 0x314   :  { %v2023_v40 = vadd.f32 1.0, %v2717_v29 }
 0x316   :  { %2718 = vrcp.f32 %v2023_v40 }
 0x323   :  { %v2719_v52 = vpop.eup %2718 }
 0x324   :  { %2031 = vperm.xlu0 %2715, %v2719_v52  }
 0x39f   :  { %v2032_v41 = vpop.permute.xlu0 %2031 }
 0x3a0   :  { %v2040_v30 = vmul.f32 %v2278_v18, %v2032_v41 }
 0x3b1   :  { %v1657_v46 = vpop.f32.mrf.mxu1 }
 0x3b3   :  { %v2670_v21 = vpop.f32.mrf.mxu1 }
 0x3b5   :  { %v1730_v24 = vpop.f32.mrf.mxu1 }
 0x3b6   :  { %v1731_v11 = vadd.f32 %v1730_v24, %v1657_v46 }
 0x3b7   :  { %v2677_v25 = vpop.f32.mrf.mxu1 }
 0x3b9   :  { %v1815_v38 = vpop.f32.mrf.mxu1 }
 0x3ba   :  { %v1819_v10 = vadd.f32 %v1815_v38, %v1731_v11 }
 0x3bb   :  { %v2684_v39 = vpop.f32.mrf.mxu1 }
 0x3bd   :  { %v1901_v14 = vpop.f32.mrf.mxu1 }
 0x3be   :  { %v1905_v26 = vadd.f32 %v1901_v14, %v1819_v10 }
 0x3bf   :  { %v2691_v27 = vpop.f32.mrf.mxu1 }
 0x3c0   :  { %v1913_v49 = vadd.f32 %v2272_v12, %v1905_v26 }
 0x3c2   :  { %v1914_v1 = vmul.f32 0.01, %v1913_v49 }
 0x3c4   :  { %v1915_v32 = vmax.f32 %v1913_v49, %v1914_v1 }
 0x3c6   :  { %2701 = vmatmul.mubr.msk.f32.vlgmr.msra.gmra.mxu0 %vm1927_vm3, %v1915_v32 }
 0x486   :  { %v1997_v54 = vpop.f32.mrf.mxu0 }
 0x487   :  { %v1998_v55 = vadd.f32 %v2273_v53, %v1997_v54 }
 0x488   :  { %v2702_v16 = vpop.f32.mrf.mxu0 }
 0x489   :  { %v2001_v34 = vmul.f32 0.01, %v1998_v55 }
 0x48b   :  { %v2002_v4 = vmax.f32 %v1998_v55, %v2001_v34 }
 0x48d   :  { %2708 = vmatmul.mubr.msk.f32.vlgmr.msra.gmra.mxu1 %vm76_vm0, %v2002_v4 }
 0x54d   :  { %v2110_v31 = vpop.f32.mrf.mxu1 }
 0x54e   :  { %v2111_v56 = vadd.f32 %v2110_v31, %v2040_v30 }
 0x54f   :  { %v2709_v57 = vpop.f32.mrf.mxu1 }
 0x550   :  { %v2121_v43 = vadd.f32 %v2280_v42, %v2111_v56 }
 0x552   :  { %v2281_v33 = vmul.f32 -1.442695, %v2121_v43 }
 0x554   :  { %2720 = vpow2.f32 %v2281_v33 }
 0x561   :  { %v2721_v58 = vpop.eup %2720 }
 0x562   :  { %v2125_v59 = vadd.f32 1.0, %v2721_v58 }
 0x564   :  { %2722 = vrcp.f32 %v2125_v59 }
 0x571   :  { %v2723_v6 = vpop.eup %2722 }
 0x572   :  { %2129 = vst.msk [vmem:[%s3461_s15] sm:$0xff] %vm2128_vm4, %v2723_v6 }

</bundles_post_ra>
